<compile_context>
chip_gen: v7x
topology: tpu7x:2x2x1
jax: 0.10.0
libtpu: 0.0.40
codegen_flags: <defaults>
</compile_context>

<pallas_src>
import functools

import jax
import jax.numpy as jnp
from jax.experimental import pallas as pl
from jax.experimental.pallas import tpu as pltpu


def _round_up(x, m):
    return ((x + m - 1) // m) * m


def _vocab_tiling(vocab_size, tn):
    """(TN, V_pad): lane-dense vocab tiles; keep >= 2 tiles when the vocab allows so the
    'parallel' vocab grid axis actually splits across v7x's two TensorCores."""
    v128 = _round_up(vocab_size, 128)
    tile = min(tn, v128)
    if v128 >= 256 and tile >= v128:          # would be a single tile: split in two
        tile = _round_up((v128 + 1) // 2, 128)
    return tile, _round_up(v128, tile)


# ---------------------------------------------------------------------------
# Kernel A: fused GRU cell + dot attention + concat->tanh
# ---------------------------------------------------------------------------
def _gru_attn_kernel(x_ref, h_ref, enc_ref,
                     w_i_ref, w_h_ref, b_i3_ref, b_hn_ref,
                     w_ch_ref, w_cc_ref, b_cat_ref,
                     cat_ref, hid_ref):
    f32 = jnp.float32
    bf16 = jnp.bfloat16
    H = hid_ref.shape[-1]                     # padded hidden width (multiple of 128)

    x = x_ref[...]                            # (B, H) bf16 embedded token
    h = h_ref[...]                            # (B, H) f32 previous hidden
    hb = h.astype(bf16)

    # ---- GRU cell, PyTorch gate order (r, z, n). Gate weights fused to (H, 3H):
    #      two MXU pushes instead of six; slices at multiples of H are lane-aligned. ----
    gi = jnp.dot(x, w_i_ref[...], preferred_element_type=f32) + b_i3_ref[...]   # (B, 3H)
    gh = jnp.dot(hb, w_h_ref[...], preferred_element_type=f32)                  # (B, 3H)

    r = jax.nn.sigmoid(gi[:, 0:H] + gh[:, 0:H])
    z = jax.nn.sigmoid(gi[:, H:2 * H] + gh[:, H:2 * H])
    n = jnp.tanh(gi[:, 2 * H:3 * H] + r * (gh[:, 2 * H:3 * H] + b_hn_ref[...]))
    h_new = (1.0 - z) * n + z * h             # (B, H) f32 == rnn_output == hidden[0]

    # ---- dot-score attention on VPU/XLU: S is small (<=MAX_LENGTH), so mul + reduce
    #      beats B_pad tiny M=1 MXU passes on the critical path. Exact softmax. ----
    enc = enc_ref[...]                        # (B, S, H) f32
    scores = jnp.sum(h_new[:, None, :] * enc, axis=-1)                 # (B, S)
    smax = jnp.max(scores, axis=-1, keepdims=True)
    e = jnp.exp(scores - smax)
    attn = e / jnp.sum(e, axis=-1, keepdims=True)                      # (B, S)
    ctx = jnp.sum(attn[:, :, None] * enc, axis=1)                      # (B, H) f32

    # ---- Luong concat Linear: concat avoided via two (H,H) matmuls summed ----
    concat_out = jnp.tanh(
        jnp.dot(h_new.astype(bf16), w_ch_ref[...], preferred_element_type=f32)
        + jnp.dot(ctx.astype(bf16), w_cc_ref[...], preferred_element_type=f32)
        + b_cat_ref[...])                                              # (B, H) f32

    cat_ref[...] = concat_out.astype(bf16)
    hid_ref[...] = h_new


# ---------------------------------------------------------------------------
# Kernel B: vocab-tiled output projection (raw logits; softmax in wrapper)
# ---------------------------------------------------------------------------
def _out_proj_kernel(c_ref, w_ref, b_ref, o_ref):
    o_ref[...] = (jnp.dot(c_ref[...], w_ref[...],
                          preferred_element_type=jnp.float32)
                  + b_ref[...])


# ---------------------------------------------------------------------------
# One-time weight preparation (hoisted out of the decode step)
# ---------------------------------------------------------------------------
def prepare_params(params, *, tn=2048):
    """Pad H to a lane-dense multiple of 128, fuse GRU gate weights, pre-sum r/z biases,
    split w_cat, pad the vocab projection and cast weight streams to bf16 — once."""
    H = params["emb"].shape[1]
    V = params["w_out"].shape[1]
    H_pad = _round_up(H, 128)
    TN, V_pad = _vocab_tiling(V, tn)

    bf = lambda a: a.astype(jnp.bfloat16)
    pad_hh = lambda w: jnp.pad(w, ((0, H_pad - H), (0, H_pad - H)))     # (H,H)->(H_pad,H_pad)
    pad_row = lambda b: jnp.pad(b, ((0, 0), (0, H_pad - H)))            # (1,H)->(1,H_pad)

    w_i = jnp.concatenate([pad_hh(params["w_ir"]), pad_hh(params["w_iz"]),
                           pad_hh(params["w_in"])], axis=1)             # (H_pad, 3*H_pad)
    w_h = jnp.concatenate([pad_hh(params["w_hr"]), pad_hh(params["w_hz"]),
                           pad_hh(params["w_hn"])], axis=1)             # (H_pad, 3*H_pad)
    b_i3 = jnp.concatenate([pad_row(params["b_ir"] + params["b_hr"]),
                            pad_row(params["b_iz"] + params["b_hz"]),
                            pad_row(params["b_in"])], axis=1)           # (1, 3*H_pad)

    # Zero padding keeps the math exact: padded hidden columns stay identically zero.
    prep = {
        "emb": bf(jnp.pad(params["emb"], ((0, 0), (0, H_pad - H)))),
        "w_i": bf(w_i),
        "w_h": bf(w_h),
        "b_i3": b_i3,
        "b_hn": pad_row(params["b_hn"]),
        "w_cat_h": bf(pad_hh(params["w_cat"][:H, :])),   # acts on rnn_output
        "w_cat_c": bf(pad_hh(params["w_cat"][H:, :])),   # acts on context
        "b_cat": pad_row(params["b_cat"]),
        "w_out": bf(jnp.pad(params["w_out"], ((0, H_pad - H), (0, V_pad - V)))),
        "b_out": jnp.pad(params["b_out"], ((0, 0), (0, V_pad - V))),
    }
    return prep


# ---------------------------------------------------------------------------
# Wrapper matching LuongAttnDecoderRNN.forward (eval mode)
# ---------------------------------------------------------------------------
def luong_attn_decoder_step(prep, input_step, last_hidden, encoder_outputs,
                            *, vocab_size, tn=2048):
    """input_step (1,B) int32, last_hidden (1,B,H) f32, encoder_outputs (S,B,H) f32
    -> (output (B,V) f32 softmax, hidden (1,B,H) f32). `tn` must match prepare_params."""
    B = input_step.shape[1]
    H = last_hidden.shape[2]
    H_pad = prep["w_i"].shape[0]
    V = vocab_size
    TN, V_pad = _vocab_tiling(V, tn)
    assert prep["w_out"].shape == (H_pad, V_pad), "prepare_params/tn mismatch"
    B_pad = _round_up(B, 16)                  # bf16 packs 16 sublanes per vreg

    # ---- plain-JAX glue: embedding lookup (table already bf16 + H_pad wide),
    #      layout/pad of per-step activations only (weights already prepped). ----
    # TODO(synk): nn.Dropout(0.1) is identity in eval mode; training-mode dropout not implemented.
    embedded = jnp.pad(prep["emb"][input_step[0]], ((0, B_pad - B), (0, 0)))       # (B_pad,H_pad) bf16
    h_prev = jnp.pad(last_hidden[0], ((0, B_pad - B), (0, H_pad - H)))             # (B_pad,H_pad) f32
    enc = jnp.pad(jnp.transpose(encoder_outputs, (1, 0, 2)),
                  ((0, B_pad - B), (0, 0), (0, H_pad - H)))                        # (B_pad,S,H_pad) f32

    # ---- Kernel A: GRU + attention + concat->tanh (whole-weight resident in VMEM).
    #      16*H_pad^2 bf16 bytes + enc must stay under the 32 MiB scoped limit
    #      (v7x physical VMEM is 64 MiB/TC — don't rely on raising the limit there;
    #      tile the fused 3H matmuls over a grid axis instead if H grows past ~1.3k). ----
    vm = pl.BlockSpec(memory_space=pltpu.MemorySpace.VMEM)
    concat_bf, h_new = pl.pallas_call(
        _gru_attn_kernel,
        out_shape=(jax.ShapeDtypeStruct((B_pad, H_pad), jnp.bfloat16),
                   jax.ShapeDtypeStruct((B_pad, H_pad), jnp.float32)),
        in_specs=[vm] * 10,
        out_specs=(vm, vm),
        compiler_params=pltpu.CompilerParams(vmem_limit_bytes=32 * 1024 * 1024),
    )(embedded, h_prev, enc,
      prep["w_i"], prep["w_h"], prep["b_i3"], prep["b_hn"],
      prep["w_cat_h"], prep["w_cat_c"], prep["b_cat"])

    # ---- Kernel B: vocab-tiled projection; bf16 weight stream, lane-dense f32 logits ----
    n_tiles = V_pad // TN
    w_spec_kwargs = {}
    if n_tiles >= 3:
        w_spec_kwargs["pipeline_mode"] = pl.Buffered(3)   # deeper weight prefetch
    logits = pl.pallas_call(
        _out_proj_kernel,
        out_shape=jax.ShapeDtypeStruct((B_pad, V_pad), jnp.float32),
        grid=(n_tiles,),
        in_specs=[pl.BlockSpec((B_pad, H_pad), lambda j: (0, 0)),
                  pl.BlockSpec((H_pad, TN), lambda j: (0, j), **w_spec_kwargs),
                  pl.BlockSpec((1, TN), lambda j: (0, j))],
        out_specs=pl.BlockSpec((B_pad, TN), lambda j: (0, j)),
        compiler_params=pltpu.CompilerParams(
            dimension_semantics=("parallel",),            # v7x: both TCs split V
            vmem_limit_bytes=32 * 1024 * 1024),
    )(concat_bf, prep["w_out"], prep["b_out"])

    # ---- epilogue (plain JAX): drop padding, softmax over the real vocab ----
    output = jax.nn.softmax(logits[:B, :V], axis=1)
    hidden = h_new[:B, :H][None, :, :]
    return output, hidden


# ---------------------------------------------------------------------------
# Parameter init + pure-f32 reference (for a tolerance sanity check)
# ---------------------------------------------------------------------------
def init_params(key, vocab_size, hidden_size):
    H = hidden_size
    ks = jax.random.split(key, 18)

    def rnd(k, shape, scale=0.08):
        return (scale * jax.random.normal(k, shape)).astype(jnp.float32)

    p = {"emb": rnd(ks[0], (vocab_size, H))}
    # GRU weights per gate (r, z, n), pre-transposed so the kernel does x @ W
    for i, name in enumerate(("w_ir", "w_iz", "w_in", "w_hr", "w_hz", "w_hn")):
        p[name] = rnd(ks[1 + i], (H, H))
    for i, name in enumerate(("b_ir", "b_iz", "b_in", "b_hr", "b_hz", "b_hn")):
        p[name] = rnd(ks[7 + i], (1, H))
    # concat Linear (2H -> H), stored transposed (2H, H)
    p["w_cat"] = rnd(ks[13], (2 * H, H))
    p["b_cat"] = rnd(ks[14], (1, H))
    # out Linear (H -> V), stored transposed (H, V)
    p["w_out"] = rnd(ks[15], (H, vocab_size))
    p["b_out"] = rnd(ks[16], (1, vocab_size))
    return p


def _reference_step(params, input_step, last_hidden, encoder_outputs):
    """Pure-f32 plain-JAX reference mirroring LuongAttnDecoderRNN.forward (eval)."""
    x = params["emb"][input_step[0]]
    h = last_hidden[0]
    r = jax.nn.sigmoid(x @ params["w_ir"] + params["b_ir"] + h @ params["w_hr"] + params["b_hr"])
    z = jax.nn.sigmoid(x @ params["w_iz"] + params["b_iz"] + h @ params["w_hz"] + params["b_hz"])
    n = jnp.tanh(x @ params["w_in"] + params["b_in"] + r * (h @ params["w_hn"] + params["b_hn"]))
    h_new = (1.0 - z) * n + z * h
    enc = jnp.transpose(encoder_outputs, (1, 0, 2))           # (B, S, H)
    scores = jnp.sum(h_new[:, None, :] * enc, axis=-1)        # (B, S)
    attn = jax.nn.softmax(scores, axis=-1)
    ctx = jnp.einsum("bs,bsh->bh", attn, enc)
    cat = jnp.tanh(jnp.concatenate([h_new, ctx], axis=1) @ params["w_cat"] + params["b_cat"])
    logits = cat @ params["w_out"] + params["b_out"]
    return jax.nn.softmax(logits, axis=1), h_new[None, :, :]


if __name__ == "__main__":
    B, H, S, V = 2, 32, 8, 40
    key = jax.random.PRNGKey(0)
    kp, k1, k2, k3 = jax.random.split(key, 4)

    params = init_params(kp, V, H)
    prep = prepare_params(params)             # one-time hoisted weight preprocessing
    input_step = jax.random.randint(k1, (1, B), 0, V, dtype=jnp.int32)      # (1, batch)
    last_hidden = (0.1 * jax.random.normal(k2, (1, B, H))).astype(jnp.float32)
    encoder_outputs = (0.1 * jax.random.normal(k3, (S, B, H))).astype(jnp.float32)

    step = jax.jit(luong_attn_decoder_step, static_argnames=("vocab_size", "tn"))
    output, hidden = step(prep, input_step, last_hidden, encoder_outputs, vocab_size=V)
    jax.block_until_ready((output, hidden))

    assert output.shape == (B, V) and hidden.shape == (1, B, H)
    assert jnp.allclose(jnp.sum(output, axis=1), 1.0, atol=1e-4)
    assert bool(jnp.all(jnp.isfinite(output))) and bool(jnp.all(jnp.isfinite(hidden)))

    out_ref, hid_ref = _reference_step(params, input_step, last_hidden, encoder_outputs)
    assert jnp.allclose(output, out_ref, atol=2e-2), "softmax output mismatch vs f32 reference"
    assert jnp.allclose(hidden, hid_ref, atol=2e-2), "hidden state mismatch vs f32 reference"

    print("KERNEL_OK")
</pallas_src>

<mosaic_0001>
module attributes {stable_mosaic.version = 11 : i64} {
  func.func @_out_proj_kernel(%arg0: i32, %arg1: memref<16x128xbf16, #tpu.memory_space<vmem>>, %arg2: memref<128x128xbf16, #tpu.memory_space<vmem>>, %arg3: memref<1x128xf32, #tpu.memory_space<vmem>>, %arg4: memref<16x128xf32, #tpu.memory_space<vmem>>) attributes {dimension_semantics = [#tpu.dimension_semantics<parallel>], iteration_bounds = array<i64: 1>, scalar_prefetch = 0 : i64, scratch_operands = 0 : i64, tpu.core_type = #tpu.core_type<tc>, window_params = [{pipeline_mode = #tpu.pipeline_mode<synchronous>, transform_indices = @transform_0, window_bounds = array<i64: 16, 128>}, {transform_indices = @transform_1, window_bounds = array<i64: 128, 128>}, {transform_indices = @transform_2, window_bounds = array<i64: 1, 128>}, {transform_indices = @transform_3, window_bounds = array<i64: 16, 128>}]} {
    %c0 = arith.constant 0 : index
    %c0_0 = arith.constant 0 : index
    %0 = vector.load %arg1[%c0, %c0_0] : memref<16x128xbf16, #tpu.memory_space<vmem>>, vector<16x128xbf16>
    %c0_1 = arith.constant 0 : index
    %c0_2 = arith.constant 0 : index
    %1 = vector.load %arg2[%c0_1, %c0_2] : memref<128x128xbf16, #tpu.memory_space<vmem>>, vector<128x128xbf16>
    %cst = arith.constant dense<0.000000e+00> : vector<16x128xf32>
    %2 = tpu.matmul %0, %1, %cst {dimension_numbers = #tpu.dot_dimension_numbers<[1], [0], [0], [1], [0, 0, 1, 1], [], []>} : vector<16x128xbf16>, vector<128x128xbf16>, vector<16x128xf32> -> vector<16x128xf32>
    %c0_3 = arith.constant 0 : index
    %c0_4 = arith.constant 0 : index
    %3 = vector.load %arg3[%c0_3, %c0_4] : memref<1x128xf32, #tpu.memory_space<vmem>>, vector<1x128xf32>
    %4 = vector.broadcast %3 : vector<1x128xf32> to vector<16x128xf32>
    %5 = arith.addf %2, %4 : vector<16x128xf32>
    %c0_5 = arith.constant 0 : index
    %c0_6 = arith.constant 0 : index
    %6 = vector.load %arg4[%c0_5, %c0_6] : memref<16x128xf32, #tpu.memory_space<vmem>>, vector<16x128xf32>
    tpu.vector_store %arg4[%c0_5, %c0_6], %5 {strides = array<i32>} : memref<16x128xf32, #tpu.memory_space<vmem>>, vector<16x128xf32>,
    return
  }
  func.func @transform_0(%arg0: i32) -> (i32, i32) {
    %c0_i32 = arith.constant 0 : i32
    %c0_i32_0 = arith.constant 0 : i32
    %c0_i32_1 = arith.constant 0 : i32
    return %c0_i32, %c0_i32_0 : i32, i32
  }
  func.func @transform_1(%arg0: i32) -> (i32, i32) {
    %c0_i32 = arith.constant 0 : i32
    %c0_i32_0 = arith.constant 0 : i32
    return %c0_i32, %arg0 : i32, i32
  }
  func.func @transform_2(%arg0: i32) -> (i32, i32) {
    %c0_i32 = arith.constant 0 : i32
    %c0_i32_0 = arith.constant 0 : i32
    return %c0_i32, %arg0 : i32, i32
  }
  func.func @transform_3(%arg0: i32) -> (i32, i32) {
    %c0_i32 = arith.constant 0 : i32
    %c0_i32_0 = arith.constant 0 : i32
    return %c0_i32, %arg0 : i32, i32
  }
}

module attributes {stable_mosaic.version = 11 : i64} {
  func.func @_gru_attn_kernel(%arg0: memref<16x128xbf16, #tpu.memory_space<vmem>>, %arg1: memref<16x128xf32, #tpu.memory_space<vmem>>, %arg2: memref<16x8x128xf32, #tpu.memory_space<vmem>>, %arg3: memref<128x384xbf16, #tpu.memory_space<vmem>>, %arg4: memref<128x384xbf16, #tpu.memory_space<vmem>>, %arg5: memref<1x384xf32, #tpu.memory_space<vmem>>, %arg6: memref<1x128xf32, #tpu.memory_space<vmem>>, %arg7: memref<128x128xbf16, #tpu.memory_space<vmem>>, %arg8: memref<128x128xbf16, #tpu.memory_space<vmem>>, %arg9: memref<1x128xf32, #tpu.memory_space<vmem>>, %arg10: memref<16x128xbf16, #tpu.memory_space<vmem>>, %arg11: memref<16x128xf32, #tpu.memory_space<vmem>>) attributes {dimension_semantics = [], scalar_prefetch = 0 : i64, scratch_operands = 0 : i64, tpu.core_type = #tpu.core_type<tc>} {
    %c0 = arith.constant 0 : index
    %c0_0 = arith.constant 0 : index
    %0 = vector.load %arg0[%c0, %c0_0] : memref<16x128xbf16, #tpu.memory_space<vmem>>, vector<16x128xbf16>
    %c0_1 = arith.constant 0 : index
    %c0_2 = arith.constant 0 : index
    %1 = vector.load %arg1[%c0_1, %c0_2] : memref<16x128xf32, #tpu.memory_space<vmem>>, vector<16x128xf32>
    %2 = arith.truncf %1 : vector<16x128xf32> to vector<16x128xbf16>
    %c0_3 = arith.constant 0 : index
    %c0_4 = arith.constant 0 : index
    %3 = vector.load %arg3[%c0_3, %c0_4] : memref<128x384xbf16, #tpu.memory_space<vmem>>, vector<128x384xbf16>
    %cst = arith.constant dense<0.000000e+00> : vector<16x384xf32>
    %4 = tpu.matmul %0, %3, %cst {dimension_numbers = #tpu.dot_dimension_numbers<[1], [0], [0], [1], [0, 0, 1, 1], [], []>} : vector<16x128xbf16>, vector<128x384xbf16>, vector<16x384xf32> -> vector<16x384xf32>
    %c0_5 = arith.constant 0 : index
    %c0_6 = arith.constant 0 : index
    %5 = vector.load %arg5[%c0_5, %c0_6] : memref<1x384xf32, #tpu.memory_space<vmem>>, vector<1x384xf32>
    %6 = vector.broadcast %5 : vector<1x384xf32> to vector<16x384xf32>
    %7 = arith.addf %4, %6 : vector<16x384xf32>
    %c0_7 = arith.constant 0 : index
    %c0_8 = arith.constant 0 : index
    %8 = vector.load %arg4[%c0_7, %c0_8] : memref<128x384xbf16, #tpu.memory_space<vmem>>, vector<128x384xbf16>
    %cst_9 = arith.constant dense<0.000000e+00> : vector<16x384xf32>
    %9 = tpu.matmul %2, %8, %cst_9 {dimension_numbers = #tpu.dot_dimension_numbers<[1], [0], [0], [1], [0, 0, 1, 1], [], []>} : vector<16x128xbf16>, vector<128x384xbf16>, vector<16x384xf32> -> vector<16x384xf32>
    %10 = vector.extract_strided_slice %7 {offsets = [0, 0], sizes = [16, 128], strides = [1, 1]} : vector<16x384xf32> to vector<16x128xf32>
    %11 = vector.extract_strided_slice %9 {offsets = [0, 0], sizes = [16, 128], strides = [1, 1]} : vector<16x384xf32> to vector<16x128xf32>
    %12 = arith.addf %10, %11 : vector<16x128xf32>
    %13 = arith.negf %12 : vector<16x128xf32>
    %14 = math.exp %13 : vector<16x128xf32>
    %cst_10 = arith.constant 1.000000e+00 : f32
    %15 = vector.broadcast %cst_10 : f32 to vector<16x128xf32>
    %16 = arith.addf %15, %14 : vector<16x128xf32>
    %17 = arith.divf %15, %16 : vector<16x128xf32>
    %18 = vector.extract_strided_slice %7 {offsets = [0, 128], sizes = [16, 128], strides = [1, 1]} : vector<16x384xf32> to vector<16x128xf32>
    %19 = vector.extract_strided_slice %9 {offsets = [0, 128], sizes = [16, 128], strides = [1, 1]} : vector<16x384xf32> to vector<16x128xf32>
    %20 = arith.addf %18, %19 : vector<16x128xf32>
    %21 = arith.negf %20 : vector<16x128xf32>
    %22 = math.exp %21 : vector<16x128xf32>
    %cst_11 = arith.constant 1.000000e+00 : f32
    %23 = vector.broadcast %cst_11 : f32 to vector<16x128xf32>
    %24 = arith.addf %23, %22 : vector<16x128xf32>
    %25 = arith.divf %23, %24 : vector<16x128xf32>
    %26 = vector.extract_strided_slice %7 {offsets = [0, 256], sizes = [16, 128], strides = [1, 1]} : vector<16x384xf32> to vector<16x128xf32>
    %27 = vector.extract_strided_slice %9 {offsets = [0, 256], sizes = [16, 128], strides = [1, 1]} : vector<16x384xf32> to vector<16x128xf32>
    %c0_12 = arith.constant 0 : index
    %c0_13 = arith.constant 0 : index
    %28 = vector.load %arg6[%c0_12, %c0_13] : memref<1x128xf32, #tpu.memory_space<vmem>>, vector<1x128xf32>
    %29 = vector.broadcast %28 : vector<1x128xf32> to vector<16x128xf32>
    %30 = arith.addf %27, %29 : vector<16x128xf32>
    %31 = arith.mulf %17, %30 : vector<16x128xf32>
    %32 = arith.addf %26, %31 : vector<16x128xf32>
    %33 = math.tanh %32 : vector<16x128xf32>
    %cst_14 = arith.constant 1.000000e+00 : f32
    %34 = vector.broadcast %cst_14 : f32 to vector<16x128xf32>
    %35 = arith.subf %34, %25 : vector<16x128xf32>
    %36 = arith.mulf %35, %33 : vector<16x128xf32>
    %37 = arith.mulf %25, %1 : vector<16x128xf32>
    %38 = arith.addf %36, %37 : vector<16x128xf32>
    %c0_15 = arith.constant 0 : index
    %c0_16 = arith.constant 0 : index
    %c0_17 = arith.constant 0 : index
    %39 = vector.load %arg2[%c0_15, %c0_16, %c0_17] : memref<16x8x128xf32, #tpu.memory_space<vmem>>, vector<16x8x128xf32>
    %40 = vector.shape_cast %38 : vector<16x128xf32> to vector<16x1x128xf32>
    %41 = vector.broadcast %40 : vector<16x1x128xf32> to vector<16x8x128xf32>
    %42 = arith.mulf %41, %39 : vector<16x8x128xf32>
    %cst_18 = arith.constant dense<0.000000e+00> : vector<16x8xf32>
    %43 = vector.multi_reduction <add>, %42, %cst_18 [2] : vector<16x8x128xf32> to vector<16x8xf32>
    %cst_19 = arith.constant dense<0xFF800000> : vector<16xf32>
    %44 = vector.multi_reduction <maximumf>, %43, %cst_19 [1] : vector<16x8xf32> to vector<16xf32>
    %45 = vector.shape_cast %44 : vector<16xf32> to vector<16x1xf32>
    %46 = vector.broadcast %45 : vector<16x1xf32> to vector<16x8xf32>
    %47 = arith.subf %43, %46 : vector<16x8xf32>
    %48 = math.exp %47 : vector<16x8xf32>
    %cst_20 = arith.constant dense<0.000000e+00> : vector<16xf32>
    %49 = vector.multi_reduction <add>, %48, %cst_20 [1] : vector<16x8xf32> to vector<16xf32>
    %50 = vector.shape_cast %49 : vector<16xf32> to vector<16x1xf32>
    %51 = vector.broadcast %50 : vector<16x1xf32> to vector<16x8xf32>
    %52 = arith.divf %48, %51 : vector<16x8xf32>
    %53 = vector.shape_cast %52 : vector<16x8xf32> to vector<16x8x1xf32>
    %54 = vector.broadcast %53 : vector<16x8x1xf32> to vector<16x8x128xf32>
    %55 = arith.mulf %54, %39 : vector<16x8x128xf32>
    %cst_21 = arith.constant dense<0.000000e+00> : vector<16x128xf32>
    %56 = vector.multi_reduction <add>, %55, %cst_21 [1] : vector<16x8x128xf32> to vector<16x128xf32>
    %57 = arith.truncf %38 : vector<16x128xf32> to vector<16x128xbf16>
    %c0_22 = arith.constant 0 : index
    %c0_23 = arith.constant 0 : index
    %58 = vector.load %arg7[%c0_22, %c0_23] : memref<128x128xbf16, #tpu.memory_space<vmem>>, vector<128x128xbf16>
    %cst_24 = arith.constant dense<0.000000e+00> : vector<16x128xf32>
    %59 = tpu.matmul %57, %58, %cst_24 {dimension_numbers = #tpu.dot_dimension_numbers<[1], [0], [0], [1], [0, 0, 1, 1], [], []>} : vector<16x128xbf16>, vector<128x128xbf16>, vector<16x128xf32> -> vector<16x128xf32>
    %60 = arith.truncf %56 : vector<16x128xf32> to vector<16x128xbf16>
    %c0_25 = arith.constant 0 : index
    %c0_26 = arith.constant 0 : index
    %61 = vector.load %arg8[%c0_25, %c0_26] : memref<128x128xbf16, #tpu.memory_space<vmem>>, vector<128x128xbf16>
    %cst_27 = arith.constant dense<0.000000e+00> : vector<16x128xf32>
    %62 = tpu.matmul %60, %61, %cst_27 {dimension_numbers = #tpu.dot_dimension_numbers<[1], [0], [0], [1], [0, 0, 1, 1], [], []>} : vector<16x128xbf16>, vector<128x128xbf16>, vector<16x128xf32> -> vector<16x128xf32>
    %63 = arith.addf %59, %62 : vector<16x128xf32>
    %c0_28 = arith.constant 0 : index
    %c0_29 = arith.constant 0 : index
    %64 = vector.load %arg9[%c0_28, %c0_29] : memref<1x128xf32, #tpu.memory_space<vmem>>, vector<1x128xf32>
    %65 = vector.broadcast %64 : vector<1x128xf32> to vector<16x128xf32>
    %66 = arith.addf %63, %65 : vector<16x128xf32>
    %67 = math.tanh %66 : vector<16x128xf32>
    %68 = arith.truncf %67 : vector<16x128xf32> to vector<16x128xbf16>
    %c0_30 = arith.constant 0 : index
    %c0_31 = arith.constant 0 : index
    %69 = vector.load %arg10[%c0_30, %c0_31] : memref<16x128xbf16, #tpu.memory_space<vmem>>, vector<16x128xbf16>
    tpu.vector_store %arg10[%c0_30, %c0_31], %68 {strides = array<i32>} : memref<16x128xbf16, #tpu.memory_space<vmem>>, vector<16x128xbf16>,
    %c0_32 = arith.constant 0 : index
    %c0_33 = arith.constant 0 : index
    %70 = vector.load %arg11[%c0_32, %c0_33] : memref<16x128xf32, #tpu.memory_space<vmem>>, vector<16x128xf32>
    tpu.vector_store %arg11[%c0_32, %c0_33], %38 {strides = array<i32>} : memref<16x128xf32, #tpu.memory_space<vmem>>, vector<16x128xf32>,
    return
  }
}

</mosaic_0001>

<bundles_post_ra>
// kernel: luong_attn_decoder_step.3
= control target key start
LH: loop header
LB: loop body
LE: loop exit
PB: predicated region body
PF: predicated region fallthrough
CT: control target
= control target key end

     0   :  { %v191_v0 = vmov 0.0   ;;  %vm192_vm0 = vmmov 0   ;;  %s249_s1 = inlined_call_operand.vmem [shape: bf16[128,128], index: 1, kind: input, shape index: {}]   ;;  %s250_s0 = inlined_call_operand.vmem [shape: bf16[16,128], index: 0, kind: input, shape index: {}]   ;;  %s251_s2 = inlined_call_operand.vmem [shape: f32[1,128], index: 2, kind: input, shape index: {}]   ;;  %s252_s3 = inlined_call_operand.vmem [shape: f32[16,128], index: 3, kind: output, shape index: {}]  }
   0x1   :  { %160 = vmatprep.subr.bf16.mxu0 %v191_v0  ;;  %v182_v1 = vld [vmem:[%s249_s1] sm:$0xff]   ;;  %176 = vmatprep.mubr.msk.bf16.mxu0 %vm192_vm0, %v191_v0  ;;  %v183_v2 = vld [vmem:[%s249_s1 + $0x8] sm:$0xff]   ;;  %v184_v3 = vld [vmem:[%s249_s1 + $0x10] sm:$0xff]  }
   0x2   :  { %161 = vmatpush3.bf16.msra.mxu0 %v182_v1  ;;  %v185_v4 = vld [vmem:[%s249_s1 + $0x18] sm:$0xff]   ;;  %v186_v5 = vld [vmem:[%s249_s1 + $0x20] sm:$0xff]   ;;  %v187_v6 = vld [vmem:[%s249_s1 + $0x28] sm:$0xff]  }
   0x3   :  { %162 = vmatprep.subr.bf16.mxu0 %v191_v0  ;;  %v188_v7 = vld [vmem:[%s249_s1 + $0x30] sm:$0xff]   ;;  %v189_v8 = vld [vmem:[%s249_s1 + $0x38] sm:$0xff]   ;;  %v190_v9 = vld [vmem:[%s250_s0] sm:$0xff]  }
   0x4   :  { %v141_v10 = vld [vmem:[%s251_s2] ss:$0 sm:$0xff] }
   0x6   :  { %163 = vmatpush3.bf16.msra.mxu0 %v183_v2 }
   0x7   :  { %164 = vmatprep.subr.bf16.mxu0 %v191_v0 }
   0xa   :  { %165 = vmatpush3.bf16.msra.mxu0 %v184_v3 }
   0xb   :  { %166 = vmatprep.subr.bf16.mxu0 %v191_v0 }
   0xe   :  { %167 = vmatpush3.bf16.msra.mxu0 %v185_v4 }
   0xf   :  { %168 = vmatprep.subr.bf16.mxu0 %v191_v0 }
  0x12   :  { %169 = vmatpush3.bf16.msra.mxu0 %v186_v5 }
  0x13   :  { %170 = vmatprep.subr.bf16.mxu0 %v191_v0 }
  0x16   :  { %171 = vmatpush3.bf16.msra.mxu0 %v187_v6 }
  0x17   :  { %172 = vmatprep.subr.bf16.mxu0 %v191_v0 }
  0x1a   :  { %173 = vmatpush3.bf16.msra.mxu0 %v188_v7 }
  0x1b   :  { %174 = vmatprep.subr.bf16.mxu0 %v191_v0 }
  0x1e   :  { %175 = vmatpush3.bf16.msra.mxu0 %v189_v8 }
  0x21   :  { %177 = vmatmul.mubr.bf16.vlgmr.msra.gmra.mrb[0].mxu0 %v190_v9 }
  0xf4   :  { %v128_v11 = vpop.f32.mrb[0].mxu0 }
  0xf5   :  { %v129_v12 = vadd.f32 %v141_v10, %v128_v11  ;;  %v178_v13 = vpop.f32.mrb[1].mxu0 }
  0xf6   :  { %v131_v14 = vpop.f32.mrb[2].mxu0 }
  0xf7   :  { %135 = vst [vmem:[%s252_s3] sm:$0xff] %v129_v12  ;;  %v132_v15 = vadd.f32 %v141_v10, %v131_v14  ;;  %v179_v16 = vpop.f32.mrb[3].mxu0 }
  0xf9   :  { %136 = vst [vmem:[%s252_s3 + $0x8] sm:$0xff] %v132_v15 }

// kernel: luong_attn_decoder_step.2
= control target key start
LH: loop header
LB: loop body
LE: loop exit
PB: predicated region body
PF: predicated region fallthrough
CT: control target
= control target key end

     0   :  { %17 = vsyncpa [#allocation3], 0  ;;  %s3175_s0 = inlined_call_operand.vmem [shape: bf16[16,128], index: 0, kind: input, shape index: {}]   ;;  %s3176_s1 = inlined_call_operand.vmem [shape: f32[16,128], index: 1, kind: input, shape index: {}]   ;;  %s3177_s2 = inlined_call_operand.vmem [shape: f32[16,8,128], index: 2, kind: input, shape index: {}]   ;;  %s3178_s3 = inlined_call_operand.vmem [shape: bf16[128,384], index: 3, kind: input, shape index: {}]   ;;  %s3179_s4 = inlined_call_operand.hbm [shape: bf16[128,384], index: 4, kind: input, shape index: {}]   ;;  %s3180_s5 = inlined_call_operand.hbm [shape: f32[1,384], index: 5, kind: input, shape index: {}]   ;;  %s3181_s6 = inlined_call_operand.hbm [shape: f32[1,128], index: 6, kind: input, shape index: {}]   ;;  %s3182_s7 = inlined_call_operand.vmem [shape: bf16[128,128], index: 7, kind: input, shape index: {}]   ;;  %s3183_s8 = inlined_call_operand.hbm [shape: bf16[128,128], index: 8, kind: input, shape index: {}]   ;;  %s3184_s9 = inlined_call_operand.hbm [shape: f32[1,128], index: 9, kind: input, shape index: {}]   ;;  %s3185_s10 = inlined_call_operand.vmem [shape: bf16[16,128], index: 10, kind: output, shape index: {0}]   ;;  %s3186_s11 = inlined_call_operand.vmem [shape: f32[16,128], index: 11, kind: output, shape index: {1}]  }
   0x1   :  { %18 = vsyncpa [#allocation5], 0 }
   0x2   :  { %19 = vsyncpa [#allocation8], 0  ;;  %s2422_s17 = smov [#allocation4]   ;;  %s2423_s19 = smov [#allocation7]  }
   0x3   :  { %s46_s18 = sshll.u32 %s2422_s17, 4  ;;  %s67_s20 = sshll.u32 %s2423_s19, 4  ;;  %s47_s18 = int_to_ptr.vmem [resolvable:$true] %s46_s18  ;;  %s2495_s20 = int_to_ptr.vmem [resolvable:$true] %s67_s20 }
   0x4   :  { %s2306_s23 = scalar_lea.hbm %s3180_s5, 48 }
   0x5   :  { %p2307_p0 = scmp.ne.s32.totalorder %s3180_s5, %s2306_s23  ;;  %p2310_p1 = scmp.lt.u32.totalorder %s2306_s23, %s3180_s5 }
   0x7   :  { %p2312_p2 = pnand %p2310_p1, %p2307_p0 }
   0x9   :  { %2315 = shalt.err (!%p2312_p2)
}
   0xa   :  { %s2316_s28 = scalar_lea.vmem %s47_s18, 48  ;;  %s2320_s29 = scalar_lea.vmem %s47_s18, 64 }
   0xb   :  { %p2317_p3 = scmp.ne.s32.totalorder %s47_s18, %s2316_s28  ;;  %p2321_p4 = scmp.lt.s32.totalorder %s47_s18, %s47_s18 }
   0xc   :  { %p2322_p5 = scmp.lt.s32.totalorder %s2320_s29, %s2316_s28 }
   0xe   :  { %p2323_p6 = por %p2322_p5, %p2321_p4 }
  0x10   :  { %p2324_p7 = pnand %p2323_p6, %p2317_p3 }
  0x12   :  { %2327 = shalt.err (!%p2324_p7)
}
  0x13   :  { %49 = dma.hbm_to_vmem [thread:$0]  %s3180_s5, 48, %s47_s18, [#allocation5]  }
  0x14   :  { %s2328_s15 = scalar_lea.hbm %s3183_s8, 1024 }
  0x15   :  { %p2329_p8 = scmp.ne.s32.totalorder %s3183_s8, %s2328_s15  ;;  %p2332_p9 = scmp.lt.u32.totalorder %s2328_s15, %s3183_s8 }
  0x17   :  { %p2334_p10 = pnand %p2332_p9, %p2329_p8 }
  0x19   :  { %2337 = shalt.err (!%p2334_p10)
}
  0x1a   :  { %s2338_s22 = scalar_lea.vmem %s2495_s20, 1024  ;;  %p2343_p12 = scmp.lt.s32.totalorder %s2495_s20, %s2495_s20 }
  0x1b   :  { %p2339_p11 = scmp.ne.s32.totalorder %s2495_s20, %s2338_s22  ;;  %p2344_p13 = scmp.lt.s32.totalorder %s2338_s22, %s2338_s22 }
  0x1d   :  { %p2345_p0 = por %p2344_p13, %p2343_p12 }
  0x1f   :  { %p2346_p1 = pnand %p2345_p0, %p2339_p11 }
  0x21   :  { %2349 = shalt.err (!%p2346_p1)
}
  0x22   :  { %s2424_s5 = smov 64   ;;  %s2425_s18 = smov 4  }
  0x23   :  { %73 = dma.hbm_to_vmem [thread:$0]  %s3183_s8, 1024, %s2495_s20, [#allocation8], %s2424_s5, %s2424_s5, %s2425_s18  }
  0x24   :  { %s2426_s25 = smov [#allocation2]   ;;  %s2350_s29 = scalar_lea.hbm %s3179_s4, 3072 }
  0x25   :  { %s33_s26 = sshll.u32 %s2426_s25, 4  ;;  %p2351_p2 = scmp.ne.s32.totalorder %s3179_s4, %s2350_s29  ;;  %s34_s26 = int_to_ptr.vmem [resolvable:$true] %s33_s26 }
  0x26   :  { %p2354_p3 = scmp.lt.u32.totalorder %s2350_s29, %s3179_s4 }
  0x28   :  { %p2356_p4 = pnand %p2354_p3, %p2351_p2 }
  0x2a   :  { %2359 = shalt.err (!%p2356_p4)
}
  0x2b   :  { %s2360_s15 = scalar_lea.vmem %s34_s26, 3072  ;;  %p2365_p6 = scmp.lt.s32.totalorder %s34_s26, %s34_s26 }
  0x2c   :  { %p2361_p5 = scmp.ne.s32.totalorder %s34_s26, %s2360_s15  ;;  %p2366_p7 = scmp.lt.s32.totalorder %s2360_s15, %s2360_s15 }
  0x2e   :  { %p2367_p8 = por %p2366_p7, %p2365_p6 }
  0x30   :  { %p2368_p9 = pnand %p2367_p8, %p2361_p5 }
  0x32   :  { %2371 = shalt.err (!%p2368_p9)
}
  0x33   :  { %s2427_s8 = smov 192   ;;  %s2428_s20 = smov 12  }
  0x34   :  { %39 = dma.hbm_to_vmem [thread:$0]  %s3179_s4, 3072, %s34_s26, [#allocation3], %s2427_s8, %s2427_s8, %s2428_s20  }
  0x35   :  { %s2429_s19 = smov [#allocation6]   ;;  %s2430_s22 = smov [#allocation9]  }
  0x36   :  { %s56_s21 = sshll.u32 %s2429_s19, 4  ;;  %s80_s5 = sshll.u32 %s2430_s22, 4  ;;  %s57_s21 = int_to_ptr.vmem [resolvable:$true] %s56_s21  ;;  %s81_s5 = int_to_ptr.vmem [resolvable:$true] %s80_s5 }
  0x37   :  { %s2372_s24 = scalar_lea.hbm %s3181_s6, 16 }
  0x38   :  { %p2373_p10 = scmp.ne.s32.totalorder %s3181_s6, %s2372_s24  ;;  %p2376_p11 = scmp.lt.u32.totalorder %s2372_s24, %s3181_s6 }
  0x3a   :  { %p2378_p12 = pnand %p2376_p11, %p2373_p10 }
  0x3c   :  { %2381 = shalt.err (!%p2378_p12)
}
  0x3d   :  { %s2382_s4 = scalar_lea.vmem %s57_s21, 16  ;;  %s2386_s26 = scalar_lea.vmem %s57_s21, 32 }
  0x3e   :  { %p2383_p13 = scmp.ne.s32.totalorder %s57_s21, %s2382_s4  ;;  %p2387_p0 = scmp.lt.s32.totalorder %s57_s21, %s57_s21 }
  0x3f   :  { %p2388_p1 = scmp.lt.s32.totalorder %s2386_s26, %s2382_s4 }
  0x41   :  { %p2389_p2 = por %p2388_p1, %p2387_p0 }
  0x43   :  { %p2390_p3 = pnand %p2389_p2, %p2383_p13 }
  0x45   :  { %2393 = shalt.err (!%p2390_p3)
}
  0x46   :  { %59 = dma.hbm_to_vmem [thread:$0]  %s3181_s6, 16, %s57_s21, [#allocation5]  }
  0x47   :  { %s2394_s15 = scalar_lea.hbm %s3184_s9, 16 }
  0x48   :  { %p2395_p4 = scmp.ne.s32.totalorder %s3184_s9, %s2394_s15  ;;  %p2398_p5 = scmp.lt.u32.totalorder %s2394_s15, %s3184_s9 }
  0x4a   :  { %p2400_p6 = pnand %p2398_p5, %p2395_p4 }
  0x4c   :  { %2403 = shalt.err (!%p2400_p6)
}
  0x4d   :  { %s2404_s19 = scalar_lea.vmem %s81_s5, 16  ;;  %s2408_s22 = scalar_lea.vmem %s81_s5, 32 }
  0x4e   :  { %p2405_p7 = scmp.ne.s32.totalorder %s81_s5, %s2404_s19  ;;  %p2409_p8 = scmp.lt.s32.totalorder %s81_s5, %s81_s5 }
  0x4f   :  { %p2410_p9 = scmp.lt.s32.totalorder %s2408_s22, %s2404_s19 }
  0x51   :  { %p2411_p10 = por %p2410_p9, %p2409_p8 }
  0x53   :  { %p2412_p11 = pnand %p2411_p10, %p2405_p7 }
  0x55   :  { %2415 = shalt.err (!%p2412_p11)
}
  0x56   :  { %83 = dma.hbm_to_vmem [thread:$0]  %s3184_s9, 16, %s81_s5, [#allocation8]  }
  0x57   :  { %2416 = dma.done.wait [#allocation3], 3072  }
  0x58   :  { %2417 = vsyncadd [#allocation3], 4294964224 }
  0x59   :  { %2418 = dma.done.wait [#allocation5], 64  }
  0x5a   :  { %2419 = vsyncadd [#allocation5], 4294967232 }
  0x5b   :  { %2420 = dma.done.wait [#allocation8], 1040  }
  0x5c   :  { %2421 = vsyncadd [#allocation8], 4294966256  ;;  %v3187_v0 = vmov 0.0   ;;  %v2432_v1 = vmov 0   ;;  %vm2433_vm0 = vmmov 0   ;;  %v2167_v26 = vld [vmem:[%s3175_s0] sm:$0xff]  }
  0x5d   :  { %2034 = vmatprep.subr.bf16.mxu1 %v3187_v0  ;;  %320 = vmatprep.mubr.bf16.mxu0 %v2432_v1  ;;  %v2137_v2 = vld [vmem:[%s3178_s3 + $0x4] ss:$12 sps:$4 sm:$0xff]   ;;  %v2139_v3 = vld [vmem:[%s3178_s3] ss:$12 sps:$4 sm:$0xff]   ;;  %v2140_v4 = vld [vmem:[%s3178_s3 + $0x1c] ss:$12 sps:$4 sm:$0xff]  }
  0x5e   :  { %2050 = vmatprep.mubr.msk.bf16.mxu1 %vm2433_vm0, %v3187_v0  ;;  %2136 = vset.pattern.permute.xlu1 %v2432_v1  ;;  %v2142_v5 = vld [vmem:[%s3178_s3 + $0x18] ss:$12 sps:$4 sm:$0xff]   ;;  %v2143_v6 = vld [vmem:[%s3178_s3 + $0x34] ss:$12 sps:$4 sm:$0xff]   ;;  %v2145_v7 = vld [vmem:[%s3178_s3 + $0x30] ss:$12 sps:$4 sm:$0xff]  }
  0x5f   :  { %2135 = vset.pattern.permute.xlu0 %v2432_v1  ;;  %288 = vmatprep.subr.bf16.mxu0 %v2137_v2  ;;  %v2146_v8 = vld [vmem:[%s3178_s3 + $0x4c] ss:$12 sps:$4 sm:$0xff]   ;;  %v2157_v9 = vld [vmem:[%s3178_s3 + $0x8] ss:$12 sps:$4 sm:$0xff]   ;;  %v2149_v11 = vld [vmem:[%s3178_s3 + $0x64] ss:$12 sps:$4 sm:$0xff]  }
  0x60   :  { %289 = vmatpush1.bf16.msra.mxu0 %v2139_v3  ;;  %v2148_v10 = vld [vmem:[%s3178_s3 + $0x48] ss:$12 sps:$4 sm:$0xff]   ;;  %2035 = vmatpush3.bf16.msra.mxu1 %v2157_v9  ;;  %v2161_v12 = vld [vmem:[%s3178_s3 + $0x20] ss:$12 sps:$4 sm:$0xff]   ;;  %v2163_v14 = vld [vmem:[%s3178_s3 + $0x38] ss:$12 sps:$4 sm:$0xff]   ;;  %v139_v3 = vlaneseq }
  0x61   :  { %290 = vmatprep.subr.bf16.mxu0 %v2140_v4  ;;  %2036 = vmatprep.subr.bf16.mxu1 %v3187_v0  ;;  %v2151_v13 = vld [vmem:[%s3178_s3 + $0x60] ss:$12 sps:$4 sm:$0xff]   ;;  %v2152_v15 = vld [vmem:[%s3178_s3 + $0x7c] ss:$12 sps:$4 sm:$0xff]   ;;  %v2154_v16 = vld [vmem:[%s3178_s3 + $0x78] ss:$12 sps:$4 sm:$0xff]  }
  0x62   :  { %v2168_v17 = vld [vmem:[%s3178_s3 + $0x50] ss:$12 sps:$4 sm:$0xff]   ;;  %v2155_v18 = vld [vmem:[%s3178_s3 + $0x94] ss:$12 sps:$4 sm:$0xff]   ;;  %v2159_v21 = vld [vmem:[%s3178_s3 + $0xac] ss:$12 sps:$4 sm:$0xff]  }
  0x63   :  { %v2158_v19 = vld [vmem:[%s3178_s3 + $0x90] ss:$12 sps:$4 sm:$0xff]   ;;  %v2172_v20 = vld [vmem:[%s3178_s3 + $0x68] ss:$12 sps:$4 sm:$0xff]   ;;  %v2176_v23 = vld [vmem:[%s3178_s3 + $0x80] ss:$12 sps:$4 sm:$0xff]  }
  0x64   :  { %291 = vmatpush1.bf16.msra.mxu0 %v2142_v5  ;;  %2037 = vmatpush3.bf16.msra.mxu1 %v2161_v12  ;;  %v2162_v22 = vld [vmem:[%s3178_s3 + $0xa8] ss:$12 sps:$4 sm:$0xff]   ;;  %v2166_v24 = vld [vmem:[#allocation2 + $0x4] ss:$12 sps:$4 sm:$0xff]   ;;  %v2164_v25 = vld [vmem:[#allocation2] ss:$12 sps:$4 sm:$0xff]  }
  0x65   :  { %292 = vmatprep.subr.bf16.mxu0 %v2143_v6  ;;  %2038 = vmatprep.subr.bf16.mxu1 %v3187_v0  ;;  %v2180_v27 = vld [vmem:[%s3178_s3 + $0x98] ss:$12 sps:$4 sm:$0xff]   ;;  %v2171_v28 = vld [vmem:[#allocation2 + $0x1c] ss:$12 sps:$4 sm:$0xff]   ;;  %v2175_v31 = vld [vmem:[#allocation2 + $0x34] ss:$12 sps:$4 sm:$0xff]  }
  0x66   :  { %v2169_v29 = vld [vmem:[#allocation2 + $0x18] ss:$12 sps:$4 sm:$0xff]   ;;  %v2184_v30 = vld [vmem:[%s3178_s3 + $0xb0] ss:$12 sps:$4 sm:$0xff]   ;;  %v2191_v34 = vld [vmem:[#allocation2 + $0x8] ss:$12 sps:$4 sm:$0xff]  }
  0x67   :  { %v2173_v32 = vld [vmem:[#allocation2 + $0x30] ss:$12 sps:$4 sm:$0xff]   ;;  %v2179_v33 = vld [vmem:[#allocation2 + $0x4c] ss:$12 sps:$4 sm:$0xff]   ;;  %v2177_v35 = vld [vmem:[#allocation2 + $0x48] ss:$12 sps:$4 sm:$0xff]  }
  0x68   :  { %293 = vmatpush1.bf16.msra.mxu0 %v2145_v7  ;;  %2039 = vmatpush3.bf16.msra.mxu1 %v2163_v14  ;;  %v2195_v36 = vld [vmem:[#allocation2 + $0x20] ss:$12 sps:$4 sm:$0xff]   ;;  %v2183_v37 = vld [vmem:[#allocation2 + $0x64] ss:$12 sps:$4 sm:$0xff]   ;;  %v2187_v40 = vld [vmem:[#allocation2 + $0x7c] ss:$12 sps:$4 sm:$0xff]  }
  0x69   :  { %294 = vmatprep.subr.bf16.mxu0 %v2146_v8  ;;  %2040 = vmatprep.subr.bf16.mxu1 %v3187_v0  ;;  %v2181_v38 = vld [vmem:[#allocation2 + $0x60] ss:$12 sps:$4 sm:$0xff]   ;;  %v2196_v39 = vld [vmem:[#allocation2 + $0x38] ss:$12 sps:$4 sm:$0xff]   ;;  %v2197_v42 = vld [vmem:[#allocation2 + $0x50] ss:$12 sps:$4 sm:$0xff]  }
  0x6a   :  { %v2185_v41 = vld [vmem:[#allocation2 + $0x78] ss:$12 sps:$4 sm:$0xff]   ;;  %v2190_v43 = vld [vmem:[#allocation2 + $0x94] ss:$12 sps:$4 sm:$0xff]   ;;  %v2188_v44 = vld [vmem:[#allocation2 + $0x90] ss:$12 sps:$4 sm:$0xff]  }
  0x6b   :  { %v2198_v45 = vld [vmem:[#allocation2 + $0x68] ss:$12 sps:$4 sm:$0xff]   ;;  %v2194_v46 = vld [vmem:[#allocation2 + $0xac] ss:$12 sps:$4 sm:$0xff]   ;;  %v2661_v48 = vld [vmem:[%s3176_s1] sm:$0xff]  ;;  %v2711_v4 = vshrl.u32 %v139_v3, 7 }
  0x6c   :  { %295 = vmatpush1.bf16.msra.mxu0 %v2148_v10  ;;  %2041 = vmatpush3.bf16.msra.mxu1 %v2168_v17  ;;  %v2192_v47 = vld [vmem:[#allocation2 + $0xa8] ss:$12 sps:$4 sm:$0xff]   ;;  %v2199_v50 = vld [vmem:[#allocation2 + $0x80] ss:$12 sps:$4 sm:$0xff]   ;;  %v2200_v52 = vld [vmem:[#allocation2 + $0x98] ss:$12 sps:$4 sm:$0xff]  }
  0x6d   :  { %296 = vmatprep.subr.bf16.mxu0 %v2149_v11  ;;  %2042 = vmatprep.subr.bf16.mxu1 %v3187_v0  ;;  %v2666_v49 = vld [vmem:[%s3176_s1 + $0x8] sm:$0xff]  ;;  %v2201_v53 = vld [vmem:[#allocation2 + $0xb0] ss:$12 sps:$4 sm:$0xff]   ;;  %v2202_v54 = vld [vmem:[%s3182_s7] sm:$0xff]   ;;  %v2714_v5 = vsub.s32 0, %v2711_v4  ;;  %v2717_v7 = vsub.s32 1, %v2711_v4 }
  0x6e   :  { %v104_v51 = vpack.c.bf16 %v2666_v49, %v2661_v48  ;;  %v2203_v55 = vld [vmem:[%s3182_s7 + $0x8] sm:$0xff]   ;;  %v2204_v56 = vld [vmem:[%s3182_s7 + $0x10] sm:$0xff]   ;;  %v2205_v57 = vld [vmem:[%s3182_s7 + $0x18] sm:$0xff]   ;;  %vm993_vm1 = vcmask 1041409   ;;  %vm995_vm2 = vcmask 1042434   ;;  %vm997_vm3 = vcmask 1043459  }
  0x6f   :  { %v2206_v58 = vld [vmem:[%s3182_s7 + $0x20] sm:$0xff]   ;;  %v2207_v59 = vld [vmem:[%s3182_s7 + $0x28] sm:$0xff]   ;;  %v2208_v60 = vld [vmem:[%s3182_s7 + $0x30] sm:$0xff]   ;;  %vm999_vm4 = vcmask 1044484   ;;  %vm1001_vm5 = vcmask 1045509   ;;  %vm1003_vm6 = vcmask 1046534  }
  0x70   :  { %297 = vmatpush1.bf16.msra.mxu0 %v2151_v13  ;;  %2043 = vmatpush3.bf16.msra.mxu1 %v2172_v20  ;;  %v2209_v61 = vld [vmem:[%s3182_s7 + $0x38] sm:$0xff]   ;;  %v137_v6 = vld [vmem:[#allocation4] sm:$0x7]  ;;  %vm1005_vm7 = vcmask 1047559   ;;  %vm1016_vm8 = vcmask 64512  }
  0x71   :  { %298 = vmatprep.subr.bf16.mxu0 %v2152_v15  ;;  %2044 = vmatprep.subr.bf16.mxu1 %v3187_v0  ;;  %v142_v8 = vrot.slane %v137_v6, %v2714_v5  ;;  %v146_v10 = vrot.slane %v137_v6, %v2717_v7 }
  0x74   :  { %299 = vmatpush1.bf16.msra.mxu0 %v2154_v16  ;;  %2045 = vmatpush3.bf16.msra.mxu1 %v2176_v23 }
  0x75   :  { %300 = vmatprep.subr.bf16.mxu0 %v2155_v18  ;;  %2046 = vmatprep.subr.bf16.mxu1 %v3187_v0 }
  0x78   :  { %301 = vmatpush1.bf16.msra.mxu0 %v2158_v19  ;;  %2047 = vmatpush3.bf16.msra.mxu1 %v2180_v27 }
  0x79   :  { %302 = vmatprep.subr.bf16.mxu0 %v2159_v21  ;;  %2048 = vmatprep.subr.bf16.mxu1 %v3187_v0 }
  0x7c   :  { %303 = vmatpush1.bf16.msra.mxu0 %v2162_v22  ;;  %2049 = vmatpush3.bf16.msra.mxu1 %v2184_v30  ;;  %v2722_v30 = vsub.s32 2, %v2711_v4 }
  0x7d   :  { %532 = vmatprep.subr.bf16.mxu0 %v2166_v24  ;;  %2054 = vmatprep.subr.bf16.mxu1 %v3187_v0 }
  0x7f   :  { %321 = vmatmul.mubr.bf16.vlgmr.msra.gmra.mrb[0].mxu0 %v2167_v26  ;;  %2051 = vmatmul.mubr.bf16.vlgmr.msra.gmra.mrb[0].mxu1 %v2167_v26 }
  0x80   :  { %533 = vmatpush1.bf16.msra.mxu0 %v2164_v25  ;;  %564 = vmatprep.mubr.bf16.mxu0 %v2432_v1 }
  0x81   :  { %534 = vmatprep.subr.bf16.mxu0 %v2171_v28  ;;  %2055 = vmatpush3.bf16.msra.mxu1 %v2191_v34  ;;  %v150_v34 = vrot.slane %v137_v6, %v2722_v30 }
  0x82   :  { %2056 = vmatprep.subr.bf16.mxu1 %v3187_v0  ;;  %2070 = vmatprep.mubr.msk.bf16.mxu1 %vm2433_vm0, %v3187_v0 }
  0x84   :  { %535 = vmatpush1.bf16.msra.mxu0 %v2169_v29 }
  0x85   :  { %536 = vmatprep.subr.bf16.mxu0 %v2175_v31  ;;  %2057 = vmatpush3.bf16.msra.mxu1 %v2195_v36 }
  0x86   :  { %2058 = vmatprep.subr.bf16.mxu1 %v3187_v0 }
  0x88   :  { %537 = vmatpush1.bf16.msra.mxu0 %v2173_v32  ;;  %v1971_v32 = vld [vmem:[#allocation6] ss:$0 sm:$0xff] }
  0x89   :  { %538 = vmatprep.subr.bf16.mxu0 %v2179_v33  ;;  %2059 = vmatpush3.bf16.msra.mxu1 %v2196_v39 }
  0x8a   :  { %2060 = vmatprep.subr.bf16.mxu1 %v3187_v0 }
  0x8c   :  { %539 = vmatpush1.bf16.msra.mxu0 %v2177_v35 }
  0x8d   :  { %540 = vmatprep.subr.bf16.mxu0 %v2183_v37  ;;  %2061 = vmatpush3.bf16.msra.mxu1 %v2197_v42 }
  0x8e   :  { %2062 = vmatprep.subr.bf16.mxu1 %v3187_v0 }
  0x90   :  { %541 = vmatpush1.bf16.msra.mxu0 %v2181_v38 }
  0x91   :  { %542 = vmatprep.subr.bf16.mxu0 %v2187_v40  ;;  %2063 = vmatpush3.bf16.msra.mxu1 %v2198_v45 }
  0x92   :  { %2064 = vmatprep.subr.bf16.mxu1 %v3187_v0 }
  0x94   :  { %543 = vmatpush1.bf16.msra.mxu0 %v2185_v41 }
  0x95   :  { %544 = vmatprep.subr.bf16.mxu0 %v2190_v43  ;;  %2065 = vmatpush3.bf16.msra.mxu1 %v2199_v50 }
  0x96   :  { %2066 = vmatprep.subr.bf16.mxu1 %v3187_v0 }
  0x98   :  { %545 = vmatpush1.bf16.msra.mxu0 %v2188_v44 }
  0x99   :  { %546 = vmatprep.subr.bf16.mxu0 %v2194_v46  ;;  %2067 = vmatpush3.bf16.msra.mxu1 %v2200_v52 }
  0x9a   :  { %2068 = vmatprep.subr.bf16.mxu1 %v3187_v0 }
  0x9c   :  { %547 = vmatpush1.bf16.msra.mxu0 %v2192_v47  ;;  %v2434_v47 = vmov 1966171168  }
  0x9d   :  { %2074 = vmatprep.subr.bf16.mxu0 %v3187_v0  ;;  %2069 = vmatpush3.bf16.msra.mxu1 %v2201_v53  ;;  %v687_v50 = vunpack.c.l.s4 %v2434_v47  ;;  %v2798_v47 = vld [vmem:[%s3177_s2 + $0x60] sm:$0xff] }
  0x9e   :  { %2094 = vmatprep.subr.bf16.mxu1 %v3187_v0 }
  0x9f   :  { %565 = vmatmul.mubr.bf16.vlgmr.msra.gmra.mrb[0].mxu0 %v104_v51  ;;  %v688_v52 = vunpack.c.0.s8 %v687_v50 }
  0xa0   :  { %2090 = vmatprep.mubr.msk.bf16.mxu0 %vm2433_vm0, %v3187_v0  ;;  %2071 = vmatmul.mubr.bf16.vlgmr.msra.gmra.mrb[4].mxu1 %v104_v51 }
  0xa1   :  { %2110 = vmatprep.mubr.msk.bf16.mxu1 %vm2433_vm0, %v3187_v0  ;;  %2095 = vmatpush3.bf16.msra.mxu1 %v2202_v54 }
  0xa2   :  { %2096 = vmatprep.subr.bf16.mxu1 %v3187_v0 }
  0xa5   :  { %2097 = vmatpush3.bf16.msra.mxu1 %v2203_v55 }
  0xa6   :  { %2098 = vmatprep.subr.bf16.mxu1 %v3187_v0 }
  0xa9   :  { %2099 = vmatpush3.bf16.msra.mxu1 %v2204_v56 }
  0xaa   :  { %2100 = vmatprep.subr.bf16.mxu1 %v3187_v0 }
  0xad   :  { %2101 = vmatpush3.bf16.msra.mxu1 %v2205_v57 }
  0xae   :  { %2102 = vmatprep.subr.bf16.mxu1 %v3187_v0 }
  0xb1   :  { %2103 = vmatpush3.bf16.msra.mxu1 %v2206_v58 }
  0xb2   :  { %2104 = vmatprep.subr.bf16.mxu1 %v3187_v0 }
  0xb5   :  { %2105 = vmatpush3.bf16.msra.mxu1 %v2207_v59  ;;  %v2727_v59 = vsub.s32 %v688_v52, %v2711_v4 }
  0xb6   :  { %2106 = vmatprep.subr.bf16.mxu1 %v3187_v0 }
  0xb9   :  { %2107 = vmatpush3.bf16.msra.mxu1 %v2208_v60 }
  0xba   :  { %2108 = vmatprep.subr.bf16.mxu1 %v3187_v0 }
  0xbd   :  { %2109 = vmatpush3.bf16.msra.mxu1 %v2209_v61 }
 0x152   :  { %v365_v62 = vpop.f32.mrb[0].mxu1 }
 0x153   :  { %v2052_v63 = vpop.f32.mrb[1].mxu1  ;;  %v366_v39 = vadd.f32 %v365_v62, %v150_v34 }
 0x154   :  { %v368_v1 = vpop.f32.mrb[2].mxu1 }
 0x155   :  { %v2053_v2 = vpop.f32.mrb[3].mxu1  ;;  %v369_v43 = vadd.f32 %v368_v1, %v150_v34 }
 0x172   :  { %v566_v9 = vpop.f32.mrb[0].mxu0 }
 0x173   :  { %v2114_v11 = vadd.f32 %v566_v9, %v142_v8  ;;  %v568_v12 = vpop.f32.mrb[1].mxu0  ;;  %v609_v21 = vpop.f32.mrb[4].mxu1 }
 0x174   :  { %v570_v13 = vpop.f32.mrb[2].mxu0  ;;  %v2115_v17 = vadd.f32 %v568_v12, %v146_v10  ;;  %v2072_v22 = vpop.f32.mrb[5].mxu1  ;;  %v651_v36 = vadd.f32 %v1971_v32, %v609_v21 }
 0x175   :  { %v1967_v14 = vmul.f32 -1.442695, %v2114_v11  ;;  %v2116_v15 = vadd.f32 %v570_v13, %v142_v8  ;;  %v572_v16 = vpop.f32.mrb[3].mxu0  ;;  %v612_v24 = vpop.f32.mrb[6].mxu1 }
 0x176   :  { %v2117_v19 = vadd.f32 %v572_v16, %v146_v10  ;;  %v1969_v20 = vmul.f32 -1.442695, %v2115_v17  ;;  %v2073_v25 = vpop.f32.mrb[7].mxu1  ;;  %v652_v41 = vadd.f32 %v1971_v32, %v612_v24  ;;  %v2742_v10 = vld [vmem:[%s3177_s2] sm:$0xff] }
 0x177   :  { %2218 = vpow2.f32 %v1967_v14  ;;  %v1968_v18 = vmul.f32 -1.442695, %v2116_v15  ;;  %v2750_v16 = vld [vmem:[%s3177_s2 + $0x40] sm:$0xff] }
 0x178   :  { %v1970_v23 = vmul.f32 -1.442695, %v2117_v19 }
 0x179   :  { %2220 = vpow2.f32 %v1968_v18 }
 0x17a   :  { %2222 = vpow2.f32 %v1969_v20 }
 0x17b   :  { %2224 = vpow2.f32 %v1970_v23  ;;  %v2760_v23 = vld [vmem:[%s3177_s2 + $0x8] sm:$0xff] }
 0x181   :  { %v2219_v26 = vpop.eup %2218 }
 0x182   :  { %v624_v27 = vadd.f32 1.0, %v2219_v26 }
 0x183   :  { %v2221_v28 = vpop.eup %2220 }
 0x184   :  { %2226 = vrcp.f32 %v624_v27  ;;  %v625_v29 = vadd.f32 1.0, %v2221_v28  ;;  %v2223_v31 = vpop.eup %2222  ;;  %v2768_v28 = vld [vmem:[%s3177_s2 + $0x48] sm:$0xff] }
 0x185   :  { %v2225_v33 = vpop.eup %2224  ;;  %v638_v35 = vadd.f32 1.0, %v2223_v31 }
 0x186   :  { %2228 = vrcp.f32 %v625_v29  ;;  %v639_v37 = vadd.f32 1.0, %v2225_v33  ;;  %v2776_v33 = vld [vmem:[%s3177_s2 + $0x10] sm:$0xff] }
 0x187   :  { %2230 = vrcp.f32 %v638_v35 }
 0x188   :  { %2232 = vrcp.f32 %v639_v37  ;;  %v2784_v37 = vld [vmem:[%s3177_s2 + $0x50] sm:$0xff] }
 0x18e   :  { %v2227_v38 = vpop.eup %2226 }
 0x18f   :  { %v653_v40 = vmul.f32 %v2227_v38, %v651_v36 }
 0x190   :  { %v2229_v42 = vpop.eup %2228 }
 0x191   :  { %v655_v44 = vadd.f32 %v653_v40, %v366_v39  ;;  %v654_v45 = vmul.f32 %v2229_v42, %v652_v41  ;;  %v2231_v51 = vpop.eup %2230  ;;  %v2791_v42 = vld [vmem:[%s3177_s2 + $0x20] sm:$0xff] }
 0x192   :  { %v2233_v53 = vpop.eup %2232  ;;  %v659_v54 = vsub.f32 1.0, %v2231_v51  ;;  %v663_v56 = vmul.f32 %v2231_v51, %v2661_v48 }
 0x193   :  { %2234 = vtanh.f32 %v655_v44  ;;  %v656_v46 = vadd.f32 %v654_v45, %v369_v43  ;;  %v660_v57 = vsub.f32 1.0, %v2233_v53  ;;  %v664_v61 = vmul.f32 %v2233_v53, %v2666_v49  ;;  %v2806_v53 = vld [vmem:[%s3177_s2 + $0x18] sm:$0xff] }
 0x195   :  { %2236 = vtanh.f32 %v656_v46 }
 0x19d   :  { %v2235_v55 = vpop.eup %2234 }
 0x19e   :  { %v661_v58 = vmul.f32 %v2235_v55, %v659_v54 }
 0x19f   :  { %v2237_v60 = vpop.eup %2236 }
 0x1a0   :  { %v662_v62 = vmul.f32 %v2237_v60, %v660_v57  ;;  %v665_v63 = vadd.f32 %v663_v56, %v661_v58  ;;  %v2814_v57 = vld [vmem:[%s3177_s2 + $0x58] sm:$0xff] }
 0x1a2   :  { %v666_v1 = vadd.f32 %v664_v61, %v662_v62  ;;  %1905 = vst [vmem:[%s3186_s11] sm:$0xff] %v665_v63  ;;  %v692_v2 = vrot.slane %v665_v63, %v2727_v59  ;;  %v685_v6 = vcombine.high %v665_v63, %v665_v63  ;;  %v2821_v62 = vld [vmem:[%s3177_s2 + $0x28] sm:$0xff] }
 0x1a4   :  { %v1609_v8 = vpack.c.bf16 %v666_v1, %v665_v63  ;;  %1906 = vst [vmem:[%s3186_s11 + $0x8] sm:$0xff] %v666_v1  ;;  %v708_v48 = vrot.slane %v692_v2, %v2727_v59  ;;  %v741_v9 = vrot.slane %v666_v1, %v2727_v59  ;;  %v700_v49 = vcombine.high %v692_v2, %v692_v2  ;;  %v2828_v2 = vld [vmem:[%s3177_s2 + $0x68] sm:$0xff] }
 0x1a5   :  { %v734_v11 = vcombine.high %v666_v1, %v666_v1  ;;  %v699_v18 = vrot.slane %v685_v6, %v2727_v59 }
 0x1a6   :  { %2111 = vmatmul.mubr.bf16.vlgmr.msra.gmra.mrb[8].mxu1 %v1609_v8  ;;  %v786_v12 = vrot.slane %v708_v48, %v2714_v5  ;;  %v757_v13 = vrot.slane %v741_v9, %v2727_v59  ;;  %v722_v14 = vrot.slane %v700_v49, %v2727_v59  ;;  %v749_v15 = vcombine.high %v741_v9, %v741_v9  ;;  %v2835_v9 = vld [vmem:[%s3177_s2 + $0x30] sm:$0xff] }
 0x1a7   :  { %v730_v17 = vcombine.high %v708_v48, %v708_v48  ;;  %v748_v27 = vrot.slane %v734_v11, %v2727_v59  ;;  %v715_v32 = vrot.slane %v699_v18, %v2727_v59  ;;  %v701_v41 = vcombine.high %v699_v18, %v699_v18 }
 0x1a8   :  { %v863_v19 = vmul.f32 %v786_v12, %v2742_v10  ;;  %v818_v20 = vrot.slane %v757_v13, %v2714_v5  ;;  %v790_v21 = vrot.slane %v722_v14, %v2714_v5  ;;  %v771_v22 = vrot.slane %v749_v15, %v2727_v59 }
 0x1a9   :  { %v779_v26 = vcombine.high %v757_v13, %v757_v13  ;;  %v794_v31 = vrot.slane %v730_v17, %v2714_v5  ;;  %v764_v36 = vrot.slane %v748_v27, %v2727_v59  ;;  %v802_v39 = vrot.slane %v715_v32, %v2714_v5  ;;  %v2842_v13 = vld [vmem:[%s3177_s2 + $0x70] sm:$0xff]  ;;  %v2849_v17 = vld [vmem:[%s3177_s2 + $0x38] sm:$0xff] }
 0x1aa   :  { %879 = vadd.xlane.f32.xlu0 %v863_v19  ;;  %v871_v24 = vmul.f32 %v818_v20, %v2750_v16  ;;  %v822_v25 = vrot.slane %v771_v22, %v2714_v5  ;;  %v864_v29 = vmul.f32 %v790_v21, %v2760_v23  ;;  %v732_v40 = vcombine.high %v722_v14, %v722_v14  ;;  %v2856_v20 = vld [vmem:[%s3177_s2 + $0x78] sm:$0xff] }
 0x1ab   :  { %v826_v35 = vrot.slane %v779_v26, %v2714_v5  ;;  %v865_v38 = vmul.f32 %v794_v31, %v2776_v33  ;;  %v834_v44 = vrot.slane %v764_v36, %v2714_v5  ;;  %v781_v45 = vcombine.high %v771_v22, %v771_v22  ;;  %3191 = vst [vmem:[#allocation13_spill] sm:$0xff] %v2849_v17 }
 0x1ac   :  { %895 = vadd.xlane.f32.xlu1 %v871_v24  ;;  %v872_v34 = vmul.f32 %v822_v25, %v2768_v28  ;;  %v750_v46 = vcombine.high %v748_v27, %v748_v27  ;;  %v867_v50 = vmul.f32 %v802_v39, %v2791_v42  ;;  %v798_v51 = vrot.slane %v732_v40, %v2714_v5 }
 0x1ad   :  { %v873_v43 = vmul.f32 %v826_v35, %v2784_v37  ;;  %v729_v52 = vrot.slane %v701_v41, %v2727_v59  ;;  %v875_v54 = vmul.f32 %v834_v44, %v2798_v47  ;;  %v830_v55 = vrot.slane %v781_v45, %v2714_v5  ;;  %3192 = vst [vmem:[#allocation14_spill] sm:$0xff] %v2856_v20 }
 0x1ae   :  { %881 = vadd.xlane.f32.xlu0 %v864_v29  ;;  %v778_v56 = vrot.slane %v750_v46, %v2727_v59  ;;  %v866_v58 = vmul.f32 %v798_v51, %v2806_v53  ;;  %v731_v61 = vcombine.high %v715_v32, %v715_v32  ;;  %v780_v1 = vcombine.high %v764_v36, %v764_v36 }
 0x1af   :  { %v806_v60 = vrot.slane %v729_v52, %v2714_v5  ;;  %v874_v63 = vmul.f32 %v830_v55, %v2814_v57  ;;  %v733_v48 = vcombine.high %v729_v52, %v729_v52 }
 0x1b0   :  { %897 = vadd.xlane.f32.xlu1 %v872_v34  ;;  %v838_v59 = vrot.slane %v778_v56, %v2714_v5  ;;  %v810_v8 = vrot.slane %v731_v61, %v2714_v5  ;;  %v842_v11 = vrot.slane %v780_v1, %v2714_v5  ;;  %v782_v12 = vcombine.high %v778_v56, %v778_v56 }
 0x1b1   :  { %v868_v6 = vmul.f32 %v806_v60, %v2821_v62  ;;  %v814_v15 = vrot.slane %v733_v48, %v2714_v5  ;;  %v928_v34 = vand.u32 127, %v139_v3 }
 0x1b2   :  { %883 = vadd.xlane.f32.xlu0 %v865_v38  ;;  %v876_v49 = vmul.f32 %v838_v59, %v2828_v2  ;;  %v869_v14 = vmul.f32 %v810_v8, %v2835_v9  ;;  %v877_v18 = vmul.f32 %v842_v11, %v2842_v13  ;;  %v846_v19 = vrot.slane %v782_v12, %v2714_v5 }
 0x1b3   :  { %v870_v21 = vmul.f32 %v814_v15, %v2849_v17  ;;  %v2880_v38 = vsub.s32 %v928_v34, %v2711_v4 }
 0x1b4   :  { %899 = vadd.xlane.f32.xlu1 %v873_v43  ;;  %v878_v22 = vmul.f32 %v846_v19, %v2856_v20 }
 0x1b6   :  { %887 = vadd.xlane.f32.xlu0 %v867_v50 }
 0x1b8   :  { %903 = vadd.xlane.f32.xlu1 %v875_v54 }
 0x1ba   :  { %885 = vadd.xlane.f32.xlu0 %v866_v58 }
 0x1bc   :  { %901 = vadd.xlane.f32.xlu1 %v874_v63 }
 0x1be   :  { %889 = vadd.xlane.f32.xlu0 %v868_v6 }
 0x1c0   :  { %905 = vadd.xlane.f32.xlu1 %v876_v49 }
 0x1c2   :  { %891 = vadd.xlane.f32.xlu0 %v869_v14 }
 0x1c4   :  { %907 = vadd.xlane.f32.xlu1 %v877_v18 }
 0x1c6   :  { %893 = vadd.xlane.f32.xlu0 %v870_v21 }
 0x1c8   :  { %909 = vadd.xlane.f32.xlu1 %v878_v22 }
 0x237   :  { %v2860_v24 = vpop.xlane.xlu0 %879 }
 0x238   :  { %v932_v3 = vrot.slane %v2860_v24, %v2880_v38 }
 0x239   :  { %v2862_v25 = vpop.xlane.xlu1 %895 }
 0x23a   :  { %v964_v51 = vrot.slane %v2862_v25, %v2880_v38 }
 0x23b   :  { %v2864_v26 = vpop.xlane.xlu0 %881 }
 0x23c   :  { %v936_v40 = vrot.slane %v2864_v26, %v2880_v38 }
 0x23d   :  { %v2866_v27 = vpop.xlane.xlu1 %897 }
 0x23e   :  { %v968_v44 = vrot.slane %v2866_v27, %v2880_v38  ;;  %v994_v52 = vsel %vm993_vm1, %v936_v40, %v932_v3 }
 0x23f   :  { %v2868_v29 = vpop.xlane.xlu0 %883 }
 0x240   :  { %v940_v41 = vrot.slane %v2868_v29, %v2880_v38  ;;  %v1007_v58 = vsel %vm993_vm1, %v968_v44, %v964_v51 }
 0x241   :  { %v2870_v31 = vpop.xlane.xlu1 %899 }
 0x242   :  { %v972_v46 = vrot.slane %v2870_v31, %v2880_v38  ;;  %v996_v55 = vsel %vm995_vm2, %v940_v41, %v994_v52 }
 0x243   :  { %v2872_v32 = vpop.xlane.xlu0 %887 }
 0x244   :  { %v1008_v63 = vsel %vm995_vm2, %v972_v46, %v1007_v58  ;;  %v948_v59 = vrot.slane %v2872_v32, %v2880_v38  ;;  %v2949_v58 = vsub.s32 3, %v2711_v4 }
 0x245   :  { %v2875_v35 = vpop.xlane.xlu1 %903 }
 0x246   :  { %v980_v49 = vrot.slane %v2875_v35, %v2880_v38 }
 0x247   :  { %v2877_v36 = vpop.xlane.xlu0 %885 }
 0x248   :  { %v944_v45 = vrot.slane %v2877_v36, %v2880_v38 }
 0x249   :  { %v2882_v39 = vpop.xlane.xlu1 %901 }
 0x24a   :  { %v976_v54 = vrot.slane %v2882_v39, %v2880_v38  ;;  %v998_v60 = vsel %vm997_vm3, %v944_v45, %v996_v55 }
 0x24b   :  { %v2888_v43 = vpop.xlane.xlu0 %889  ;;  %v1000_v14 = vsel %vm999_vm4, %v948_v59, %v998_v60 }
 0x24c   :  { %v952_v61 = vrot.slane %v2888_v43, %v2880_v38  ;;  %v1009_v8 = vsel %vm997_vm3, %v976_v54, %v1008_v63 }
 0x24d   :  { %v2898_v50 = vpop.xlane.xlu1 %905  ;;  %v1010_v22 = vsel %vm999_vm4, %v980_v49, %v1009_v8 }
 0x24e   :  { %v984_v48 = vrot.slane %v2898_v50, %v2880_v38  ;;  %v1002_v18 = vsel %vm1001_vm5, %v952_v61, %v1000_v14 }
 0x24f   :  { %v2906_v56 = vpop.xlane.xlu0 %891 }
 0x250   :  { %v956_v1 = vrot.slane %v2906_v56, %v2880_v38  ;;  %v1011_v41 = vsel %vm1001_vm5, %v984_v48, %v1010_v22 }
 0x251   :  { %v2917_v6 = vpop.xlane.xlu1 %907 }
 0x252   :  { %v988_v11 = vrot.slane %v2917_v6, %v2880_v38  ;;  %v1004_v21 = vsel %vm1003_vm6, %v956_v1, %v1002_v18  ;;  %v2960_v1 = vsub.s32 4, %v2711_v4 }
 0x253   :  { %v2926_v12 = vpop.xlane.xlu0 %893 }
 0x254   :  { %v960_v15 = vrot.slane %v2926_v12, %v2880_v38  ;;  %v1012_v44 = vsel %vm1003_vm6, %v988_v11, %v1011_v41 }
 0x255   :  { %v2932_v19 = vpop.xlane.xlu1 %909 }
 0x256   :  { %v992_v34 = vrot.slane %v2932_v19, %v2880_v38  ;;  %v1006_v40 = vsel %vm1005_vm7, %v960_v15, %v1004_v21  ;;  %v2970_v21 = vsub.s32 5, %v2711_v4 }
 0x257   :  { %v1017_v3 = vsel %vm1016_vm8, %v1006_v40, -inf }
 0x258   :  { %1018 = vmax.xlane.f32.xlu0 %v1017_v3  ;;  %v1013_v45 = vsel %vm1005_vm7, %v992_v34, %v1012_v44 }
 0x259   :  { %v1020_v46 = vsel %vm1016_vm8, %v1013_v45, -inf }
 0x25a   :  { %1021 = vmax.xlane.f32.xlu1 %v1020_v46 }
 0x279   :  { %v2944_v51 = vpop.f32.mrb[8].mxu1 }
 0x27a   :  { %3193 = vst [vmem:[#allocation15_spill] sm:$0xff] %v2944_v51  ;;  %v2112_v52 = vpop.f32.mrb[9].mxu1 }
 0x27b   :  { %v2946_v54 = vpop.f32.mrb[10].mxu1 }
 0x27c   :  { %3194 = vst [vmem:[#allocation16_spill] sm:$0xff] %v2946_v54  ;;  %v2113_v55 = vpop.f32.mrb[11].mxu1 }
 0x2e5   :  { %v2951_v60 = vpop.xlane.xlu0 %1018 }
 0x2e6   :  { %v1028_v61 = vrot.slane %v2951_v60, %v2714_v5  ;;  %v1032_v63 = vrot.slane %v2951_v60, %v2717_v7  ;;  %v1036_v59 = vrot.slane %v2951_v60, %v2722_v30  ;;  %v1040_v49 = vrot.slane %v2951_v60, %v2949_v58 }
 0x2e7   :  { %v2967_v18 = vpop.xlane.xlu1 %1021  ;;  %v1044_v22 = vrot.slane %v2951_v60, %v2960_v1  ;;  %v1048_v3 = vrot.slane %v2951_v60, %v2970_v21 }
 0x2e8   :  { %v1105_v8 = vsub.f32 %v2860_v24, %v1028_v61  ;;  %v1106_v48 = vsub.f32 %v2864_v26, %v1032_v63  ;;  %v1107_v11 = vsub.f32 %v2868_v29, %v1036_v59  ;;  %v1108_v24 = vsub.f32 %v2877_v36, %v1040_v49 }
 0x2e9   :  { %v1076_v34 = vrot.slane %v2967_v18, %v2960_v1  ;;  %v2978_v29 = vsub.s32 6, %v2711_v4  ;;  %v1080_v40 = vrot.slane %v2967_v18, %v2970_v21  ;;  %v1109_v44 = vsub.f32 %v2872_v32, %v1044_v22 }
 0x2ea   :  { %v1121_v14 = vmul.f32 1.442695, %v1105_v8  ;;  %v1123_v15 = vmul.f32 1.442695, %v1106_v48  ;;  %v1125_v26 = vmul.f32 1.442695, %v1107_v11  ;;  %v1110_v61 = vsub.f32 %v2888_v43, %v1048_v3 }
 0x2eb   :  { %v1117_v41 = vsub.f32 %v2875_v35, %v1076_v34  ;;  %v1127_v36 = vmul.f32 1.442695, %v1108_v24  ;;  %v1084_v45 = vrot.slane %v2967_v18, %v2978_v29  ;;  %v1118_v46 = vsub.f32 %v2898_v50, %v1080_v40 }
 0x2ec   :  { %2238 = vpow2.f32 %v1121_v14  ;;  %v1052_v55 = vrot.slane %v2951_v60, %v2978_v29  ;;  %v1129_v35 = vmul.f32 1.442695, %v1109_v44  ;;  %v2995_v59 = vsub.s32 7, %v2711_v4 }
 0x2ed   :  { %2240 = vpow2.f32 %v1123_v15  ;;  %v1145_v52 = vmul.f32 1.442695, %v1117_v41  ;;  %v1119_v8 = vsub.f32 %v2917_v6, %v1084_v45  ;;  %v1147_v48 = vmul.f32 1.442695, %v1118_v46 }
 0x2ee   :  { %2242 = vpow2.f32 %v1125_v26  ;;  %v1088_v50 = vrot.slane %v2967_v18, %v2995_v59  ;;  %v1111_v43 = vsub.f32 %v2906_v56, %v1052_v55  ;;  %v1131_v49 = vmul.f32 1.442695, %v1110_v61 }
 0x2ef   :  { %2244 = vpow2.f32 %v1127_v36  ;;  %v1060_v4 = vrot.slane %v2967_v18, %v2714_v5  ;;  %v1149_v15 = vmul.f32 1.442695, %v1119_v8  ;;  %v1064_v22 = vrot.slane %v2967_v18, %v2717_v7 }
 0x2f0   :  { %2246 = vpow2.f32 %v1145_v52  ;;  %v1120_v14 = vsub.f32 %v2932_v19, %v1088_v50  ;;  %v1133_v6 = vmul.f32 1.442695, %v1111_v43  ;;  %v1068_v19 = vrot.slane %v2967_v18, %v2722_v30 }
 0x2f1   :  { %2248 = vpow2.f32 %v1129_v35  ;;  %v1113_v56 = vsub.f32 %v2862_v25, %v1060_v4  ;;  %v1114_v34 = vsub.f32 %v2866_v27, %v1064_v22  ;;  %v1072_v25 = vrot.slane %v2967_v18, %v2949_v58 }
 0x2f2   :  { %2250 = vpow2.f32 %v1147_v48  ;;  %v1151_v26 = vmul.f32 1.442695, %v1120_v14  ;;  %v1115_v44 = vsub.f32 %v2870_v31, %v1068_v19  ;;  %v1056_v46 = vrot.slane %v2951_v60, %v2995_v59 }
 0x2f3   :  { %2252 = vpow2.f32 %v1131_v49  ;;  %v1137_v40 = vmul.f32 1.442695, %v1113_v56  ;;  %v1139_v36 = vmul.f32 1.442695, %v1114_v34  ;;  %v1116_v52 = vsub.f32 %v2882_v39, %v1072_v25 }
 0x2f4   :  { %2254 = vpow2.f32 %v1149_v15  ;;  %v1141_v55 = vmul.f32 1.442695, %v1115_v44  ;;  %v1112_v61 = vsub.f32 %v2926_v12, %v1056_v46 }
 0x2f5   :  { %2256 = vpow2.f32 %v1133_v6  ;;  %v1143_v35 = vmul.f32 1.442695, %v1116_v52 }
 0x2f6   :  { %v2992_v63 = vpop.eup %2238  ;;  %2258 = vpow2.f32 %v1151_v26  ;;  %v1135_v39 = vmul.f32 1.442695, %v1112_v61 }
 0x2f7   :  { %v2997_v32 = vpop.eup %2240  ;;  %1170 = vperm.xlu0 %2135, %v2992_v63   ;;  %2260 = vpow2.f32 %v1137_v40 }
 0x2f8   :  { %1173 = vperm.xlu1 %2136, %v2997_v32   ;;  %v3007_v11 = vpop.eup %2242  ;;  %2262 = vpow2.f32 %v1139_v36 }
 0x2f9   :  { %v3014_v24 = vpop.eup %2244  ;;  %2264 = vpow2.f32 %v1141_v55 }
 0x2fa   :  { %v3020_v41 = vpop.eup %2246  ;;  %2266 = vpow2.f32 %v1143_v35 }
 0x2fb   :  { %v3022_v3 = vpop.eup %2248  ;;  %1206 = vperm.xlu0 %2135, %v3020_v41   ;;  %2268 = vpow2.f32 %v1135_v39 }
 0x2fc   :  { %1176 = vperm.xlu1 %2136, %v3007_v11   ;;  %v3029_v45 = vpop.eup %2250 }
 0x2fd   :  { %v3031_v27 = vpop.eup %2252 }
 0x2fe   :  { %v3038_v18 = vpop.eup %2254 }
 0x2ff   :  { %1209 = vperm.xlu0 %2135, %v3029_v45   ;;  %v3040_v31 = vpop.eup %2256 }
 0x300   :  { %1179 = vperm.xlu1 %2136, %v3014_v24   ;;  %v3045_v50 = vpop.eup %2258 }
 0x301   :  { %v3047_v8 = vpop.eup %2260 }
 0x302   :  { %v3051_v60 = vpop.eup %2262 }
 0x303   :  { %1212 = vperm.xlu0 %2135, %v3038_v18   ;;  %v3054_v48 = vpop.eup %2264 }
 0x304   :  { %1182 = vperm.xlu1 %2136, %v3022_v3   ;;  %v3057_v12 = vpop.eup %2266 }
 0x305   :  { %v3060_v43 = vpop.eup %2268 }
 0x307   :  { %1215 = vperm.xlu0 %2135, %v3045_v50  }
 0x308   :  { %1185 = vperm.xlu1 %2136, %v3031_v27  }
 0x30c   :  { %1188 = vperm.xlu1 %2136, %v3040_v31  }
 0x310   :  { %1194 = vperm.xlu1 %2136, %v3047_v8  }
 0x314   :  { %1197 = vperm.xlu1 %2136, %v3051_v60  }
 0x318   :  { %1200 = vperm.xlu1 %2136, %v3054_v48  }
 0x31c   :  { %1203 = vperm.xlu1 %2136, %v3057_v12  }
 0x320   :  { %1191 = vperm.xlu1 %2136, %v3060_v43  }
 0x376   :  { %v1171_v6 = vpop.permute.xlu0 %1170 }
 0x377   :  { %v1174_v49 = vpop.permute.xlu1 %1173  ;;  %v1220_v36 = vrot.slane %v1171_v6, %v2880_v38 }
 0x378   :  { %v1224_v46 = vrot.slane %v1174_v49, %v2880_v38 }
 0x37a   :  { %v1207_v56 = vpop.permute.xlu0 %1206  ;;  %v1281_v51 = vsel %vm993_vm1, %v1224_v46, %v1220_v36 }
 0x37b   :  { %v1177_v4 = vpop.permute.xlu1 %1176 }
 0x37c   :  { %v1228_v55 = vrot.slane %v1177_v4, %v2880_v38 }
 0x37e   :  { %v1210_v34 = vpop.permute.xlu0 %1209  ;;  %v1282_v4 = vsel %vm995_vm2, %v1228_v55, %v1281_v51 }
 0x37f   :  { %v1180_v14 = vpop.permute.xlu1 %1179 }
 0x380   :  { %v1232_v35 = vrot.slane %v1180_v14, %v2880_v38 }
 0x382   :  { %v1213_v25 = vpop.permute.xlu0 %1212  ;;  %v1283_v17 = vsel %vm997_vm3, %v1232_v35, %v1282_v4 }
 0x383   :  { %v1183_v15 = vpop.permute.xlu1 %1182 }
 0x384   :  { %v1236_v0 = vrot.slane %v1183_v15, %v2880_v38  ;;  %v1272_v15 = vrot.slane %v1210_v34, %v2880_v38 }
 0x386   :  { %v1284_v46 = vsel %vm999_vm4, %v1236_v0, %v1283_v17 }
 0x387   :  { %v1186_v22 = vpop.permute.xlu1 %1185 }
 0x388   :  { %v1240_v20 = vrot.slane %v1186_v22, %v2880_v38  ;;  %v1276_v22 = vrot.slane %v1213_v25, %v2880_v38 }
 0x38b   :  { %v1189_v26 = vpop.permute.xlu1 %1188 }
 0x38c   :  { %v1244_v14 = vrot.slane %v1189_v26, %v2880_v38 }
 0x38f   :  { %v1195_v19 = vpop.permute.xlu1 %1194 }
 0x390   :  { %v1252_v39 = vrot.slane %v1195_v19, %v2880_v38 }
 0x393   :  { %v1198_v40 = vpop.permute.xlu1 %1197 }
 0x394   :  { %v1256_v52 = vrot.slane %v1198_v40, %v2880_v38  ;;  %v1268_v40 = vrot.slane %v1207_v56, %v2880_v38 }
 0x396   :  { %v1288_v6 = vsel %vm993_vm1, %v1256_v52, %v1252_v39  ;;  %v1285_v52 = vsel %vm1001_vm5, %v1240_v20, %v1284_v46 }
 0x397   :  { %v1201_v44 = vpop.permute.xlu1 %1200 }
 0x398   :  { %v1260_v61 = vrot.slane %v1201_v44, %v2880_v38  ;;  %v1216_v44 = vpop.permute.xlu0 %1215 }
 0x399   :  { %v1280_v51 = vrot.slane %v1216_v44, %v2880_v38 }
 0x39a   :  { %v1289_v19 = vsel %vm995_vm2, %v1260_v61, %v1288_v6  ;;  %v1286_v61 = vsel %vm1003_vm6, %v1244_v14, %v1285_v52 }
 0x39b   :  { %v1204_v54 = vpop.permute.xlu1 %1203 }
 0x39c   :  { %v1264_v49 = vrot.slane %v1204_v54, %v2880_v38 }
 0x39e   :  { %v1290_v36 = vsel %vm997_vm3, %v1264_v49, %v1289_v19 }
 0x39f   :  { %v1291_v54 = vsel %vm999_vm4, %v1268_v40, %v1290_v36  ;;  %v1192_v56 = vpop.permute.xlu1 %1191 }
 0x3a0   :  { %v1248_v26 = vrot.slane %v1192_v56, %v2880_v38  ;;  %v1292_v55 = vsel %vm1001_vm5, %v1272_v15, %v1291_v54 }
 0x3a1   :  { %v1293_v34 = vsel %vm1003_vm6, %v1276_v22, %v1292_v55 }
 0x3a2   :  { %v1294_v35 = vsel %vm1005_vm7, %v1280_v51, %v1293_v34  ;;  %v1287_v25 = vsel %vm1005_vm7, %v1248_v26, %v1286_v61 }
 0x3a3   :  { %v1300_v0 = vsel %vm1016_vm8, %v1294_v35, 0.0  ;;  %v1297_v17 = vsel %vm1016_vm8, %v1287_v25, 0.0 }
 0x3a4   :  { %1301 = vadd.xlane.f32.xlu0 %v1300_v0  ;;  %1298 = vadd.xlane.f32.xlu1 %v1297_v17 }
 0x431   :  { %v1302_v39 = vpop.xlane.xlu0 %1301  ;;  %v1299_v20 = vpop.xlane.xlu1 %1298 }
 0x432   :  { %v1312_v38 = vrot.slane %v1299_v20, %v2717_v7  ;;  %v1308_v6 = vrot.slane %v1299_v20, %v2714_v5  ;;  %v1316_v49 = vrot.slane %v1299_v20, %v2722_v30  ;;  %v1344_v40 = vrot.slane %v1302_v39, %v2717_v7 }
 0x433   :  { %v1320_v4 = vrot.slane %v1299_v20, %v2949_v58  ;;  %v1348_v44 = vrot.slane %v1302_v39, %v2722_v30  ;;  %v1324_v14 = vrot.slane %v1299_v20, %v2960_v1  ;;  %v1352_v19 = vrot.slane %v1302_v39, %v2949_v58 }
 0x434   :  { %2270 = vrcp.f32 %v1312_v38  ;;  %v1328_v36 = vrot.slane %v1299_v20, %v2970_v21  ;;  %v1356_v46 = vrot.slane %v1302_v39, %v2960_v1  ;;  %v1340_v51 = vrot.slane %v1302_v39, %v2714_v5 }
 0x435   :  { %2272 = vrcp.f32 %v1308_v6  ;;  %v1360_v52 = vrot.slane %v1302_v39, %v2970_v21  ;;  %v1332_v1 = vrot.slane %v1299_v20, %v2978_v29  ;;  %v1364_v34 = vrot.slane %v1302_v39, %v2978_v29 }
 0x436   :  { %2274 = vrcp.f32 %v1316_v49  ;;  %v1336_v21 = vrot.slane %v1299_v20, %v2995_v59  ;;  %v1368_v35 = vrot.slane %v1302_v39, %v2995_v59 }
 0x437   :  { %2276 = vrcp.f32 %v1344_v40 }
 0x438   :  { %2278 = vrcp.f32 %v1320_v4  ;;  %v2211_v4 = vld [vmem:[#allocation7 + $0x8] sm:$0xff]  }
 0x439   :  { %2280 = vrcp.f32 %v1348_v44  ;;  %v2216_v44 = vld [vmem:[#allocation7 + $0x30] sm:$0xff]  }
 0x43a   :  { %2282 = vrcp.f32 %v1324_v14  ;;  %v2217_v14 = vld [vmem:[#allocation7 + $0x38] sm:$0xff]  }
 0x43b   :  { %2284 = vrcp.f32 %v1352_v19 }
 0x43c   :  { %2286 = vrcp.f32 %v1328_v36 }
 0x43d   :  { %2288 = vrcp.f32 %v1356_v46 }
 0x43e   :  { %v2271_v15 = vpop.eup %2270  ;;  %2290 = vrcp.f32 %v1340_v51 }
 0x43f   :  { %v2273_v22 = vpop.eup %2272  ;;  %v1388_v7 = vmul.f32 %v2271_v15, %v2997_v32  ;;  %2292 = vrcp.f32 %v1360_v52 }
 0x440   :  { %v2275_v54 = vpop.eup %2274  ;;  %v1386_v56 = vmul.f32 %v2273_v22, %v2992_v63  ;;  %2294 = vrcp.f32 %v1332_v1 }
 0x441   :  { %v2277_v30 = vpop.eup %2276  ;;  %1424 = vperm.xlu1 %2136, %v1388_v7   ;;  %v1390_v58 = vmul.f32 %v2275_v54, %v3007_v11  ;;  %2296 = vrcp.f32 %v1364_v34 }
 0x442   :  { %1419 = vperm.xlu0 %2135, %v1386_v56   ;;  %v2279_v26 = vpop.eup %2278  ;;  %v1404_v32 = vmul.f32 %v2277_v30, %v3051_v60  ;;  %2298 = vrcp.f32 %v1336_v21 }
 0x443   :  { %v2281_v55 = vpop.eup %2280  ;;  %v1392_v63 = vmul.f32 %v2279_v26, %v3014_v24  ;;  %2300 = vrcp.f32 %v1368_v35 }
 0x444   :  { %v2283_v5 = vpop.eup %2282  ;;  %v1406_v11 = vmul.f32 %v2281_v55, %v3054_v48 }
 0x445   :  { %1429 = vperm.xlu1 %2136, %v1390_v58   ;;  %v2285_v61 = vpop.eup %2284  ;;  %v1394_v60 = vmul.f32 %v2283_v5, %v3022_v3 }
 0x446   :  { %1464 = vperm.xlu0 %2135, %v1404_v32   ;;  %v2287_v25 = vpop.eup %2286  ;;  %v1408_v24 = vmul.f32 %v2285_v61, %v3057_v12 }
 0x447   :  { %v2289_v0 = vpop.eup %2288  ;;  %v1396_v29 = vmul.f32 %v2287_v25, %v3031_v27 }
 0x448   :  { %v2291_v48 = vpop.eup %2290  ;;  %v1410_v17 = vmul.f32 %v2289_v0, %v3020_v41 }
 0x449   :  { %1434 = vperm.xlu1 %2136, %v1392_v63   ;;  %v2293_v38 = vpop.eup %2292  ;;  %v1402_v3 = vmul.f32 %v2291_v48, %v3047_v8  ;;  %v2210_v8 = vld [vmem:[#allocation7] sm:$0xff]  }
 0x44a   :  { %1469 = vperm.xlu0 %2135, %v1406_v11   ;;  %v2295_v20 = vpop.eup %2294  ;;  %v1412_v59 = vmul.f32 %v2293_v38, %v3029_v45  ;;  %2075 = vmatpush3.bf16.msra.mxu0 %v2210_v8  ;;  %v3195_v45 = vmov 0.0  }
 0x44b   :  { %v2297_v39 = vpop.eup %2296  ;;  %v1398_v12 = vmul.f32 %v2295_v20, %v3040_v31  ;;  %2076 = vmatprep.subr.bf16.mxu0 %v3195_v45  ;;  %v2212_v31 = vld [vmem:[#allocation7 + $0x10] sm:$0xff]  }
 0x44c   :  { %v2299_v6 = vpop.eup %2298  ;;  %v1414_v27 = vmul.f32 %v2297_v39, %v3038_v18  ;;  %v2213_v18 = vld [vmem:[#allocation7 + $0x18] sm:$0xff]  }
 0x44d   :  { %1439 = vperm.xlu1 %2136, %v1394_v60   ;;  %v2301_v49 = vpop.eup %2300  ;;  %v1400_v41 = vmul.f32 %v2299_v6, %v3060_v43  ;;  %v2214_v43 = vld [vmem:[#allocation7 + $0x20] sm:$0xff]  }
 0x44e   :  { %1474 = vperm.xlu0 %2135, %v1408_v24   ;;  %v1416_v40 = vmul.f32 %v2301_v49, %v3045_v50  ;;  %2077 = vmatpush3.bf16.msra.mxu0 %v2211_v4  ;;  %v2215_v50 = vld [vmem:[#allocation7 + $0x28] sm:$0xff]  }
 0x44f   :  { %2078 = vmatprep.subr.bf16.mxu0 %v3195_v45 }
 0x451   :  { %1444 = vperm.xlu1 %2136, %v1396_v29  }
 0x452   :  { %1479 = vperm.xlu0 %2135, %v1410_v17   ;;  %2079 = vmatpush3.bf16.msra.mxu0 %v2212_v31 }
 0x453   :  { %2080 = vmatprep.subr.bf16.mxu0 %v3195_v45 }
 0x455   :  { %1459 = vperm.xlu1 %2136, %v1402_v3  }
 0x456   :  { %1484 = vperm.xlu0 %2135, %v1412_v59   ;;  %2081 = vmatpush3.bf16.msra.mxu0 %v2213_v18 }
 0x457   :  { %2082 = vmatprep.subr.bf16.mxu0 %v3195_v45 }
 0x459   :  { %1449 = vperm.xlu1 %2136, %v1398_v12  }
 0x45a   :  { %1489 = vperm.xlu0 %2135, %v1414_v27   ;;  %2083 = vmatpush3.bf16.msra.mxu0 %v2214_v43 }
 0x45b   :  { %2084 = vmatprep.subr.bf16.mxu0 %v3195_v45 }
 0x45d   :  { %1454 = vperm.xlu1 %2136, %v1400_v41  }
 0x45e   :  { %1494 = vperm.xlu0 %2135, %v1416_v40   ;;  %2085 = vmatpush3.bf16.msra.mxu0 %v2215_v50 }
 0x45f   :  { %2086 = vmatprep.subr.bf16.mxu0 %v3195_v45 }
 0x462   :  { %2087 = vmatpush3.bf16.msra.mxu0 %v2216_v44 }
 0x463   :  { %2088 = vmatprep.subr.bf16.mxu0 %v3195_v45 }
 0x466   :  { %2089 = vmatpush3.bf16.msra.mxu0 %v2217_v14 }
 0x4c0   :  { %v1425_v19 = vpop.permute.xlu1 %1424 }
 0x4c1   :  { %v1498_v15 = vmul.f32 %v1425_v19, %v2760_v23  ;;  %v1420_v36 = vpop.permute.xlu0 %1419 }
 0x4c2   :  { %v1497_v22 = vmul.f32 %v1420_v36, %v2742_v10 }
 0x4c3   :  { %v1519_v7 = vrot.slane %v1498_v15, 4 }
 0x4c4   :  { %v1513_v46 = vrot.slane %v1497_v22, 4  ;;  %v1430_v54 = vpop.permute.xlu1 %1429 }
 0x4c5   :  { %v1520_v56 = vadd.f32 %v1519_v7, %v1498_v15  ;;  %v1499_v30 = vmul.f32 %v1430_v54, %v2776_v33  ;;  %v1465_v51 = vpop.permute.xlu0 %1464 }
 0x4c6   :  { %v1514_v58 = vadd.f32 %v1513_v46, %v1497_v22  ;;  %v1506_v52 = vmul.f32 %v1465_v51, %v2768_v28 }
 0x4c7   :  { %v1521_v26 = vrot.slane %v1520_v56, 2  ;;  %v1525_v32 = vrot.slane %v1499_v30, 4 }
 0x4c8   :  { %v1515_v55 = vrot.slane %v1514_v58, 2  ;;  %v1567_v1 = vrot.slane %v1506_v52, 4  ;;  %v1435_v63 = vpop.permute.xlu1 %1434 }
 0x4c9   :  { %v1522_v34 = vadd.f32 %v1521_v26, %v1520_v56  ;;  %v1526_v23 = vadd.f32 %v1525_v32, %v1499_v30  ;;  %v1500_v5 = vmul.f32 %v1435_v63, %v2806_v53  ;;  %v1470_v10 = vpop.permute.xlu0 %1469 }
 0x4ca   :  { %v1516_v11 = vadd.f32 %v1515_v55, %v1514_v58  ;;  %v1568_v61 = vadd.f32 %v1567_v1, %v1506_v52  ;;  %v1507_v21 = vmul.f32 %v1470_v10, %v2784_v37 }
 0x4cb   :  { %v1523_v60 = vrot.slane %v1522_v34, 1  ;;  %v1527_v33 = vrot.slane %v1526_v23, 2  ;;  %v1531_v35 = vrot.slane %v1500_v5, 4 }
 0x4cc   :  { %v1517_v25 = vrot.slane %v1516_v11, 1  ;;  %v1569_v24 = vrot.slane %v1568_v61, 2  ;;  %v1573_v28 = vrot.slane %v1507_v21, 4  ;;  %v1440_v0 = vpop.permute.xlu1 %1439 }
 0x4cd   :  { %v1524_v29 = vadd.f32 %v1523_v60, %v1522_v34  ;;  %v1528_v48 = vadd.f32 %v1527_v33, %v1526_v23  ;;  %v1532_v17 = vadd.f32 %v1531_v35, %v1500_v5  ;;  %v1501_v38 = vmul.f32 %v1440_v0, %v2791_v42  ;;  %v1475_v3 = vpop.permute.xlu0 %1474 }
 0x4ce   :  { %v1518_v20 = vadd.f32 %v1517_v25, %v1516_v11  ;;  %v1570_v53 = vadd.f32 %v1569_v24, %v1568_v61  ;;  %v1574_v59 = vadd.f32 %v1573_v28, %v1507_v21  ;;  %v1508_v39 = vmul.f32 %v1475_v3, %v2814_v57 }
 0x4cf   :  { %v1529_v12 = vrot.slane %v1528_v48, 1  ;;  %v1533_v37 = vrot.slane %v1532_v17, 2  ;;  %v1537_v6 = vrot.slane %v1501_v38, 4  ;;  %v1627_v31 = vpack.c.bf16 %v1524_v29, %v1524_v29 }
 0x4d0   :  { %v1571_v27 = vrot.slane %v1570_v53, 1  ;;  %v1575_v49 = vrot.slane %v1574_v59, 2  ;;  %v1579_v41 = vrot.slane %v1508_v39, 4  ;;  %v1445_v40 = vpop.permute.xlu1 %1444  ;;  %v1626_v18 = vpack.c.bf16 %v1518_v20, %v1518_v20 }
 0x4d1   :  { %v1534_v8 = vadd.f32 %v1533_v37, %v1532_v17  ;;  %v1538_v45 = vadd.f32 %v1537_v6, %v1501_v38  ;;  %v1480_v4 = vpop.permute.xlu0 %1479  ;;  %v1530_v50 = vadd.f32 %v1529_v12, %v1528_v48  ;;  %v1502_v14 = vmul.f32 %v1445_v40, %v2821_v62  ;;  %v3196_v40 = vld [vmem:[#allocation13_spill] sm:$0xff] }
 0x4d2   :  { %v1576_v43 = vadd.f32 %v1575_v49, %v1574_v59  ;;  %v1580_v42 = vadd.f32 %v1579_v41, %v1508_v39  ;;  %v1572_v19 = vadd.f32 %v1571_v27, %v1570_v53  ;;  %v1675_v46 = vunpack.c.l.b16 %v1627_v31  ;;  %v3197_v31 = vld [vmem:[#allocation14_spill] sm:$0xff] }
 0x4d3   :  { %v1535_v44 = vrot.slane %v1534_v8, 1  ;;  %v1539_v36 = vrot.slane %v1538_v45, 2  ;;  %v1543_v22 = vrot.slane %v1502_v14, 4  ;;  %v1674_v54 = vunpack.c.l.b16 %v1626_v18 }
 0x4d4   :  { %v1460_v57 = vpop.permute.xlu1 %1459  ;;  %v1577_v15 = vrot.slane %v1576_v43, 1  ;;  %v1581_v56 = vrot.slane %v1580_v42, 2  ;;  %v1509_v30 = vmul.f32 %v1480_v4, %v2798_v47  ;;  %v1628_v51 = vpack.c.bf16 %v1530_v50, %v1530_v50 }
 0x4d5   :  { %v1485_v7 = vpop.permute.xlu0 %1484  ;;  %v1536_v58 = vadd.f32 %v1535_v44, %v1534_v8  ;;  %v1544_v52 = vadd.f32 %v1543_v22, %v1502_v14  ;;  %v1635_v26 = vpack.c.bf16 %v1572_v19, %v1572_v19  ;;  %v1505_v55 = vmul.f32 %v1460_v57, %v2750_v16 }
 0x4d6   :  { %v1585_v32 = vrot.slane %v1509_v30, 4  ;;  %v1578_v62 = vadd.f32 %v1577_v15, %v1576_v43  ;;  %v1540_v63 = vadd.f32 %v1539_v36, %v1538_v45  ;;  %v1510_v23 = vmul.f32 %v1485_v7, %v2828_v2 }
 0x4d7   :  { %v1545_v34 = vrot.slane %v1544_v52, 2  ;;  %v3147_v10 = vsel %vm993_vm1, %v1675_v46, %v1674_v54  ;;  %v1582_v11 = vadd.f32 %v1581_v56, %v1580_v42  ;;  %v1561_v47 = vrot.slane %v1505_v55, 4 }
 0x4d8   :  { %v1450_v1 = vpop.permute.xlu1 %1449  ;;  %v1586_v61 = vadd.f32 %v1585_v32, %v1509_v30  ;;  %v3149_v21 = vunpack.c.l.b16 %v1628_v51  ;;  %v1629_v60 = vpack.c.bf16 %v1536_v58, %v1536_v58  ;;  %v1591_v35 = vrot.slane %v1510_v23, 4 }
 0x4d9   :  { %v1490_v5 = vpop.permute.xlu0 %1489  ;;  %v1546_v33 = vadd.f32 %v1545_v34, %v1544_v52  ;;  %v1683_v25 = vunpack.c.l.b16 %v1635_v26  ;;  %v1562_v24 = vadd.f32 %v1561_v47, %v1505_v55  ;;  %v1503_v28 = vmul.f32 %v1450_v1, %v2835_v9 }
 0x4da   :  { %v1587_v16 = vrot.slane %v1586_v61, 2  ;;  %v1636_v0 = vpack.c.bf16 %v1578_v62, %v1578_v62  ;;  %v1541_v29 = vrot.slane %v1540_v63, 1  ;;  %v1592_v2 = vadd.f32 %v1591_v35, %v1510_v23 }
 0x4db   :  { %v1511_v48 = vmul.f32 %v1490_v5, %v2842_v13  ;;  %v1583_v38 = vrot.slane %v1582_v11, 1  ;;  %v1563_v20 = vrot.slane %v1562_v24, 2  ;;  %v1549_v53 = vrot.slane %v1503_v28, 4 }
 0x4dc   :  { %v1455_v17 = vpop.permute.xlu1 %1454  ;;  %v1588_v3 = vadd.f32 %v1587_v16, %v1586_v61  ;;  %v1677_v39 = vunpack.c.l.b16 %v1629_v60  ;;  %v1547_v12 = vrot.slane %v1546_v33, 1  ;;  %v1593_v37 = vrot.slane %v1592_v2, 2 }
 0x4dd   :  { %v1495_v59 = vpop.permute.xlu0 %1494  ;;  %v1597_v6 = vrot.slane %v1511_v48, 4  ;;  %v1564_v49 = vadd.f32 %v1563_v20, %v1562_v24  ;;  %v1550_v41 = vadd.f32 %v1549_v53, %v1503_v28  ;;  %v1504_v9 = vmul.f32 %v1455_v17, %v3196_v40 }
 0x4de   :  { %v1589_v27 = vrot.slane %v1588_v3, 1  ;;  %v1542_v8 = vadd.f32 %v1541_v29, %v1540_v63  ;;  %v1594_v45 = vadd.f32 %v1593_v37, %v1592_v2  ;;  %v1512_v13 = vmul.f32 %v1495_v59, %v3197_v31 }
 0x4df   :  { %v1598_v4 = vadd.f32 %v1597_v6, %v1511_v48  ;;  %v1584_v18 = vadd.f32 %v1583_v38, %v1582_v11  ;;  %v1565_v43 = vrot.slane %v1564_v49, 1  ;;  %v1551_v42 = vrot.slane %v1550_v41, 2 }
 0x4e0   :  { %v1555_v50 = vrot.slane %v1504_v9, 4  ;;  %v1590_v44 = vadd.f32 %v1589_v27, %v1588_v3  ;;  %v1595_v14 = vrot.slane %v1594_v45, 1  ;;  %v1603_v57 = vrot.slane %v1512_v13, 4 }
 0x4e1   :  { %v1599_v19 = vrot.slane %v1598_v4, 2  ;;  %v1548_v15 = vadd.f32 %v1547_v12, %v1546_v33  ;;  %v1566_v36 = vadd.f32 %v1565_v43, %v1564_v49  ;;  %v1552_v22 = vadd.f32 %v1551_v42, %v1550_v41 }
 0x4e2   :  { %v1556_v7 = vadd.f32 %v1555_v50, %v1504_v9  ;;  %v1630_v46 = vpack.c.bf16 %v1542_v8, %v1542_v8  ;;  %v1596_v54 = vadd.f32 %v1595_v14, %v1594_v45  ;;  %v1604_v30 = vadd.f32 %v1603_v57, %v1512_v13  ;;  %v1988_v13 = vld [vmem:[#allocation9] ss:$0 sm:$0xff] }
 0x4e3   :  { %v1600_v56 = vadd.f32 %v1599_v19, %v1598_v4  ;;  %v1637_v51 = vpack.c.bf16 %v1584_v18, %v1584_v18  ;;  %v1634_v58 = vpack.c.bf16 %v1566_v36, %v1566_v36  ;;  %v1553_v52 = vrot.slane %v1552_v22, 1  ;;  %v3198_v18 = vld [vmem:[#allocation15_spill] sm:$0xff]  ;;  %v3199_v14 = vld [vmem:[#allocation16_spill] sm:$0xff] }
 0x4e4   :  { %v1557_v26 = vrot.slane %v1556_v7, 2  ;;  %v1684_v32 = vunpack.c.l.b16 %v1636_v0  ;;  %v1638_v55 = vpack.c.bf16 %v1590_v44, %v1590_v44  ;;  %v1605_v62 = vrot.slane %v1604_v30, 2 }
 0x4e5   :  { %v1601_v1 = vrot.slane %v1600_v56, 1  ;;  %v1631_v63 = vpack.c.bf16 %v1548_v15, %v1548_v15  ;;  %v1682_v34 = vunpack.c.l.b16 %v1634_v58  ;;  %v1554_v23 = vadd.f32 %v1553_v52, %v1552_v22 }
 0x4e6   :  { %v1558_v5 = vadd.f32 %v1557_v26, %v1556_v7  ;;  %v1678_v11 = vunpack.c.l.b16 %v1630_v46  ;;  %v1639_v61 = vpack.c.bf16 %v1596_v54, %v1596_v54  ;;  %v1606_v60 = vadd.f32 %v1605_v62, %v1604_v30 }
 0x4e7   :  { %v1602_v47 = vadd.f32 %v1601_v1, %v1600_v56  ;;  %v1685_v33 = vunpack.c.l.b16 %v1637_v51  ;;  %v1697_v35 = vsel %vm993_vm1, %v1683_v25, %v1682_v34  ;;  %v1632_v16 = vpack.c.bf16 %v1554_v23, %v1554_v23 }
 0x4e8   :  { %v1559_v24 = vrot.slane %v1558_v5, 1  ;;  %v1686_v28 = vunpack.c.l.b16 %v1638_v55  ;;  %v1698_v29 = vsel %vm995_vm2, %v1684_v32, %v1697_v35  ;;  %v1607_v2 = vrot.slane %v1606_v60, 1 }
 0x4e9   :  { %v1640_v0 = vpack.c.bf16 %v1602_v47, %v1602_v47  ;;  %v1691_v48 = vsel %vm995_vm2, %v3149_v21, %v3147_v10  ;;  %v1679_v17 = vunpack.c.l.b16 %v1631_v63  ;;  %v1699_v38 = vsel %vm997_vm3, %v1685_v33, %v1698_v29 }
 0x4ea   :  { %v1560_v3 = vadd.f32 %v1559_v24, %v1558_v5  ;;  %v1700_v20 = vsel %vm999_vm4, %v1686_v28, %v1699_v38  ;;  %v1687_v53 = vunpack.c.l.b16 %v1639_v61  ;;  %v1680_v59 = vunpack.c.l.b16 %v1632_v16 }
 0x4eb   :  { %v1608_v25 = vadd.f32 %v1607_v2, %v1606_v60  ;;  %v1692_v12 = vsel %vm997_vm3, %v1677_v39, %v1691_v48  ;;  %v1688_v37 = vunpack.c.l.b16 %v1640_v0 }
 0x4ec   :  { %v1633_v6 = vpack.c.bf16 %v1560_v3, %v1560_v3  ;;  %v1693_v27 = vsel %vm999_vm4, %v1678_v11, %v1692_v12  ;;  %v1701_v49 = vsel %vm1001_vm5, %v1687_v53, %v1700_v20 }
 0x4ed   :  { %v1641_v41 = vpack.c.bf16 %v1608_v25, %v1608_v25  ;;  %v1694_v10 = vsel %vm1001_vm5, %v1679_v17, %v1693_v27  ;;  %v1702_v45 = vsel %vm1003_vm6, %v1688_v37, %v1701_v49 }
 0x4ee   :  { %v1681_v21 = vunpack.c.l.b16 %v1633_v6  ;;  %v1695_v9 = vsel %vm1003_vm6, %v1680_v59, %v1694_v10 }
 0x4ef   :  { %v1689_v40 = vunpack.c.l.b16 %v1641_v41 }
 0x4f0   :  { %v1696_v8 = vsel %vm1005_vm7, %v1681_v21, %v1695_v9 }
 0x4f1   :  { %v1703_v4 = vsel %vm1005_vm7, %v1689_v40, %v1702_v45 }
 0x4f2   :  { %v1704_v39 = vpack.c.b16 %v1703_v4, %v1696_v8 }
 0x4f4   :  { %2091 = vmatmul.mubr.bf16.vlgmr.msra.gmra.mrb[4].mxu0 %v1704_v39 }
 0x5c7   :  { %v1788_v31 = vpop.f32.mrb[4].mxu0 }
 0x5c8   :  { %v1878_v43 = vadd.f32 %v3198_v18, %v1788_v31  ;;  %v2092_v42 = vpop.f32.mrb[5].mxu0 }
 0x5c9   :  { %v1791_v50 = vpop.f32.mrb[6].mxu0 }
 0x5ca   :  { %v1891_v44 = vadd.f32 %v1988_v13, %v1878_v43  ;;  %v1881_v19 = vadd.f32 %v3199_v14, %v1791_v50  ;;  %v2093_v57 = vpop.f32.mrb[7].mxu0 }
 0x5cc   :  { %v1892_v15 = vadd.f32 %v1988_v13, %v1881_v19  ;;  %2302 = vtanh.f32 %v1891_v44 }
 0x5ce   :  { %2304 = vtanh.f32 %v1892_v15 }
 0x5d6   :  { %v2303_v36 = vpop.eup %2302 }
 0x5d8   :  { %v2305_v22 = vpop.eup %2304 }
 0x5d9   :  { %v1996_v7 = vpack.c.bf16 %v2305_v22, %v2303_v36 }
 0x5db   :  { %1997 = vst [vmem:[%s3185_s10] sm:$0xff] %v1996_v7  }
 0x5dc   :  { %1915 = vsyncpa [#allocation3], 1 }
 0x5dd   :  { %1916 = vsyncpa [#allocation5], 1 }
 0x5de   :  { %1917 = vsyncpa [#allocation8], 1 }

</bundles_post_ra>
